<compile_context>
chip_gen: v6e
topology: v6e:2x2x1
jax: 0.10.0
libtpu: 0.0.40
codegen_flags: <defaults>
</compile_context>

<pallas_src>
import functools
import math

import jax
import jax.numpy as jnp
from jax.experimental import pallas as pl
from jax.experimental.pallas import tpu as pltpu


def _round_up(x, m):
    return (x + m - 1) // m * m


# ---------------------------------------------------------------------------
# Pallas matmul kernels (conv hot path): bf16 inputs, f32 accumulation
# ---------------------------------------------------------------------------
def _matmul_kernel_acc(a_ref, b_ref, o_ref, acc_ref):
    @pl.when(pl.program_id(2) == 0)
    def _():
        acc_ref[...] = jnp.zeros_like(acc_ref)

    acc_ref[...] += jnp.dot(a_ref[...], b_ref[...],
                            preferred_element_type=jnp.float32)

    @pl.when(pl.program_id(2) == pl.num_programs(2) - 1)
    def _():
        o_ref[...] = acc_ref[...]


def _matmul_kernel_single(a_ref, b_ref, o_ref):
    # Single K step: no accumulator scratch, no pl.when branches.
    o_ref[...] = jnp.dot(a_ref[...], b_ref[...],
                         preferred_element_type=jnp.float32)


def pallas_matmul(a, b, *, vmem_limit_bytes=32 * 1024 * 1024):
    """a: [M, K] float (cast to bf16); b: [Kp, N] bf16, Kp >= K, Kp%128==0, N%128==0.

    Returns [M, N] float32.  Zero-padded rows/K-tail keep the result exact.
    """
    M, K = a.shape
    Kp, N = b.shape
    assert Kp >= K and Kp % 128 == 0 and N % 128 == 0
    assert b.dtype == jnp.bfloat16

    Mp = max(8, _round_up(M, 8))
    a = a.astype(jnp.bfloat16)
    if Mp != M or Kp != K:
        a = jnp.zeros((Mp, Kp), jnp.bfloat16).at[:M, :K].set(a)

    tm = Mp                                   # M is tiny everywhere (<=128)
    if N <= 1024:
        tn = N
    elif N % 1024 == 0:
        tn = 1024
    elif N % 512 == 0:
        tn = 512
    else:
        tn = 256 if N % 256 == 0 else 128

    # Cap the bf16 B tile at ~6 MiB per buffer (12 MiB double-buffered):
    # comfortable within v7x's 64 MiB VMEM and the explicit 32 MiB scoped limit.
    max_tk = max(128, (6 * 1024 * 1024 // (tn * 2)) // 128 * 128)
    if Kp <= max_tk:
        tk = Kp
    else:
        tk = 128
        d = 256
        while d <= max_tk:
            if Kp % d == 0:
                tk = d
            d += 128
    nk = Kp // tk

    if nk == 1:
        out = pl.pallas_call(
            _matmul_kernel_single,
            out_shape=jax.ShapeDtypeStruct((Mp, N), jnp.float32),
            grid_spec=pltpu.PrefetchScalarGridSpec(
                num_scalar_prefetch=0,
                grid=(Mp // tm, N // tn),
                in_specs=[pl.BlockSpec((tm, Kp), lambda i, j: (i, 0)),
                          pl.BlockSpec((Kp, tn), lambda i, j: (0, j))],
                out_specs=pl.BlockSpec((tm, tn), lambda i, j: (i, j))),
            compiler_params=pltpu.CompilerParams(
                dimension_semantics=("parallel", "parallel"),
                vmem_limit_bytes=vmem_limit_bytes),
        )(a, b)
    else:
        out = pl.pallas_call(
            _matmul_kernel_acc,
            out_shape=jax.ShapeDtypeStruct((Mp, N), jnp.float32),
            grid_spec=pltpu.PrefetchScalarGridSpec(
                num_scalar_prefetch=0,
                grid=(Mp // tm, N // tn, nk),
                in_specs=[pl.BlockSpec((tm, tk), lambda i, j, k: (i, k)),
                          pl.BlockSpec((tk, tn), lambda i, j, k: (k, j))],
                out_specs=pl.BlockSpec((tm, tn), lambda i, j, k: (i, j)),
                scratch_shapes=[pltpu.VMEM((tm, tn), jnp.float32)]),
            compiler_params=pltpu.CompilerParams(
                dimension_semantics=("parallel", "parallel", "arbitrary"),
                vmem_limit_bytes=vmem_limit_bytes),
        )(a, b)
    return out[:M] if Mp != M else out


# ---------------------------------------------------------------------------
# Fused BatchNorm(batch stats) + affine (+residual) (+ReLU) Pallas kernel.
# Channel (lane) axis is tiled with a grid; stats are per-channel so channel
# tiles are independent.  Row axis (N*H*W) is kept whole in the block (<=128).
# ---------------------------------------------------------------------------
def _bn_kernel(x_ref, g_ref, b_ref, o_ref, *, relu, eps):
    x = x_ref[...]
    mean = jnp.mean(x, axis=0, keepdims=True)
    var = jnp.mean(jnp.square(x - mean), axis=0, keepdims=True)
    scale = g_ref[...] * jax.lax.rsqrt(var + eps)
    shift = b_ref[...] - mean * scale
    y = x * scale + shift
    if relu:
        y = jnp.maximum(y, 0.0)
    o_ref[...] = y


def _bn_res_kernel(x_ref, g_ref, b_ref, r_ref, o_ref, *, relu, eps):
    x = x_ref[...]
    mean = jnp.mean(x, axis=0, keepdims=True)
    var = jnp.mean(jnp.square(x - mean), axis=0, keepdims=True)
    scale = g_ref[...] * jax.lax.rsqrt(var + eps)
    shift = b_ref[...] - mean * scale
    y = x * scale + shift + r_ref[...]
    if relu:
        y = jnp.maximum(y, 0.0)
    o_ref[...] = y


def bn_act(x2d, gamma, beta, residual=None, relu=True, eps=1e-5):
    """x2d: [P, C] f32 (P = N*H*W); gamma/beta: [C]; optional residual [P, C]."""
    P, C = x2d.shape
    tc = 256 if C % 256 == 0 else 128
    g2 = gamma.reshape(1, C).astype(jnp.float32)
    b2 = beta.reshape(1, C).astype(jnp.float32)

    x_spec = pl.BlockSpec((P, tc), lambda j: (0, j))
    v_spec = pl.BlockSpec((1, tc), lambda j: (0, j))
    if residual is None:
        kern = functools.partial(_bn_kernel, relu=relu, eps=eps)
        in_specs = [x_spec, v_spec, v_spec]
        args = (x2d, g2, b2)
    else:
        kern = functools.partial(_bn_res_kernel, relu=relu, eps=eps)
        in_specs = [x_spec, v_spec, v_spec, x_spec]
        args = (x2d, g2, b2, residual)

    return pl.pallas_call(
        kern,
        out_shape=jax.ShapeDtypeStruct((P, C), jnp.float32),
        grid_spec=pltpu.PrefetchScalarGridSpec(
            num_scalar_prefetch=0,
            grid=(C // tc,),
            in_specs=in_specs,
            out_specs=x_spec),
        compiler_params=pltpu.CompilerParams(
            dimension_semantics=("parallel",)),
    )(*args)


# ---------------------------------------------------------------------------
# Plain-JAX glue: im2col, maxpool
# ---------------------------------------------------------------------------
def _im2col(x, kh, kw, stride, pad):
    n, h, w, c = x.shape
    xp = jnp.pad(x, ((0, 0), (pad, pad), (pad, pad), (0, 0)))
    oh = (h + 2 * pad - kh) // stride + 1
    ow = (w + 2 * pad - kw) // stride + 1
    cols = []
    for i in range(kh):
        for j in range(kw):
            cols.append(xp[:, i:i + stride * oh:stride,
                           j:j + stride * ow:stride, :])
    patches = jnp.concatenate(cols, axis=-1)          # [N, OH, OW, kh*kw*C]
    return patches.reshape(n * oh * ow, kh * kw * c), (n, oh, ow)


def conv2d(x, w_mat, kh, kw, stride, pad):
    """x: [N,H,W,Cin] f32; w_mat: [Kp, Cout] bf16 (K = kh*kw*Cin zero-padded)."""
    a, (n, oh, ow) = _im2col(x, kh, kw, stride, pad)
    out = pallas_matmul(a, w_mat)
    return out.reshape(n, oh, ow, w_mat.shape[1])


def maxpool2d(x, k=3, stride=2, pad=1):
    n, h, w, c = x.shape
    neg = jnp.finfo(x.dtype).min
    xp = jnp.pad(x, ((0, 0), (pad, pad), (pad, pad), (0, 0)),
                 constant_values=neg)
    oh = (h + 2 * pad - k) // stride + 1
    ow = (w + 2 * pad - k) // stride + 1
    out = jnp.full((n, oh, ow, c), neg, x.dtype)
    for i in range(k):
        for j in range(k):
            out = jnp.maximum(out, xp[:, i:i + stride * oh:stride,
                                      j:j + stride * ow:stride, :])
    return out


# ---------------------------------------------------------------------------
# ResNet forward (BasicBlock, num_layers=18 variant of the module)
# ---------------------------------------------------------------------------
def basic_block(x, p):
    stride = p['stride']
    out = conv2d(x, p['conv1_w'], 3, 3, stride, 1)
    n, oh, ow, c = out.shape
    o2d = bn_act(out.reshape(-1, c), p['bn1_g'], p['bn1_b'], relu=True)
    out = o2d.reshape(n, oh, ow, c)

    out = conv2d(out, p['conv2_w'], 3, 3, 1, 1)
    c2 = out.shape[-1]

    if 'ds_w' in p:                                    # downsample branch
        idn = conv2d(x, p['ds_w'], 1, 1, stride, 0)
        i2d = bn_act(idn.reshape(-1, c2), p['ds_bn_g'], p['ds_bn_b'],
                     relu=False)
    else:
        i2d = x.reshape(-1, c2)

    o2d = bn_act(out.reshape(-1, c2), p['bn2_g'], p['bn2_b'],
                 residual=i2d, relu=True)
    return o2d.reshape(out.shape)


def resnet_forward(x_nchw, params):
    x = jnp.transpose(x_nchw, (0, 2, 3, 1)).astype(jnp.float32)  # NCHW -> NHWC
    x = conv2d(x, params['conv1_w'], 7, 7, 2, 3)
    n, h, w, c = x.shape
    x = bn_act(x.reshape(-1, c), params['bn1_g'], params['bn1_b'],
               relu=True).reshape(n, h, w, c)
    x = maxpool2d(x, 3, 2, 1)
    for layer in ('layer1', 'layer2', 'layer3', 'layer4'):
        for blk in params[layer]:
            x = basic_block(x, blk)
    x = jnp.mean(x, axis=(1, 2))           # AdaptiveAvgPool2d((1,1)) + flatten
    # fc is 2048x10: plain XLA dot is cheaper than a padded Pallas launch.
    return jnp.dot(x, params['fc_w']) + params['fc_b']


# ---------------------------------------------------------------------------
# Deterministic synthetic parameters (shapes dictated by the module __init__).
# Conv weights are stored pre-reshaped to [K, Cout], K zero-padded to a
# multiple of 128, in bf16 (done once here, not per forward call).
# ---------------------------------------------------------------------------
def init_params(key, img_channels=3, num_classes=10):
    keys = iter(jax.random.split(key, 128))

    def conv_w(cin, cout, k):
        K = k * k * cin
        Kp = _round_up(K, 128)
        w = jax.random.normal(next(keys), (K, cout), jnp.float32) / math.sqrt(K)
        if Kp != K:
            w = jnp.concatenate([w, jnp.zeros((Kp - K, cout), jnp.float32)], 0)
        return w.astype(jnp.bfloat16)

    def bn(c):
        g = 1.0 + 0.1 * jax.random.normal(next(keys), (c,), jnp.float32)
        b = 0.1 * jax.random.normal(next(keys), (c,), jnp.float32)
        return g, b

    params = {}
    params['conv1_w'] = conv_w(img_channels, 256, 7)
    params['bn1_g'], params['bn1_b'] = bn(256)

    in_ch = 256
    layer_defs = [('layer1', 256, 2, 1), ('layer2', 512, 2, 2),
                  ('layer3', 1024, 2, 2), ('layer4', 2048, 2, 2)]
    for name, out_ch, blocks, stride in layer_defs:
        blks = []
        for bi in range(blocks):
            st = stride if bi == 0 else 1
            p = {'stride': st,
                 'conv1_w': conv_w(in_ch, out_ch, 3)}
            p['bn1_g'], p['bn1_b'] = bn(out_ch)
            p['conv2_w'] = conv_w(out_ch, out_ch, 3)
            p['bn2_g'], p['bn2_b'] = bn(out_ch)
            if bi == 0 and st != 1:      # module creates downsample iff stride != 1
                p['ds_w'] = conv_w(in_ch, out_ch, 1)
                p['ds_bn_g'], p['ds_bn_b'] = bn(out_ch)
            in_ch = out_ch
            blks.append(p)
        params[name] = blks

    params['fc_w'] = (jax.random.normal(next(keys), (2048, num_classes),
                                        jnp.float32) / math.sqrt(2048))
    params['fc_b'] = 0.1 * jax.random.normal(next(keys), (num_classes,),
                                             jnp.float32)
    return params


# ---------------------------------------------------------------------------
# Pure-JAX references for per-kernel unit checks
# ---------------------------------------------------------------------------
def _bn_ref(x2d, gamma, beta, residual=None, relu=True, eps=1e-5):
    mean = jnp.mean(x2d, axis=0)
    var = jnp.mean((x2d - mean) ** 2, axis=0)
    y = (x2d - mean) * (gamma * jax.lax.rsqrt(var + eps)) + beta
    if residual is not None:
        y = y + residual
    return jnp.maximum(y, 0.0) if relu else y


if __name__ == "__main__":
    key = jax.random.PRNGKey(0)
    kx, kp, k1, k2, k3, k4, k5, k6 = jax.random.split(key, 8)

    # --- unit check 1: single-K-step matmul kernel vs XLA dot (same bf16 inputs)
    a1 = jax.random.normal(k1, (32, 2304), jnp.float32).astype(jnp.bfloat16)
    b1 = jax.random.normal(k2, (2304, 512), jnp.float32).astype(jnp.bfloat16)
    o1 = pallas_matmul(a1, b1)
    r1 = jnp.dot(a1, b1, preferred_element_type=jnp.float32)
    assert jnp.allclose(o1, r1, rtol=1e-2, atol=1e-2)

    # --- unit check 2: multi-K-step (accumulator) matmul kernel
    a2 = jax.random.normal(k3, (16, 6144), jnp.float32).astype(jnp.bfloat16)
    b2 = jax.random.normal(k4, (6144, 1024), jnp.float32).astype(jnp.bfloat16)
    o2 = pallas_matmul(a2, b2)
    r2 = jnp.dot(a2, b2, preferred_element_type=jnp.float32)
    assert jnp.allclose(o2, r2, rtol=1e-2, atol=1e-2)

    # --- unit check 3: fused BN(+residual)+ReLU kernel vs plain-JAX formula
    xb = jax.random.normal(k5, (32, 256), jnp.float32)
    gb = 1.0 + 0.1 * jax.random.normal(k6, (256,), jnp.float32)
    bb = 0.1 * jax.random.normal(k6, (256,), jnp.float32)
    assert jnp.allclose(bn_act(xb, gb, bb, relu=True),
                        _bn_ref(xb, gb, bb, relu=True),
                        rtol=1e-2, atol=1e-2)
    rb = jax.random.normal(k5, (32, 256), jnp.float32)
    assert jnp.allclose(bn_act(xb, gb, bb, residual=rb, relu=True),
                        _bn_ref(xb, gb, bb, residual=rb, relu=True),
                        rtol=1e-2, atol=1e-2)

    # --- full forward at small, module-consistent shapes
    x = jax.random.normal(kx, (2, 3, 16, 16), jnp.float32)   # NCHW like PyTorch
    params = init_params(kp, img_channels=3, num_classes=10)
    logits = resnet_forward(x, params)
    logits = jax.block_until_ready(logits)

    assert logits.shape == (2, 10)
    assert bool(jnp.all(jnp.isfinite(logits)))

    print("KERNEL_OK")
</pallas_src>

<mosaic_0001>
module attributes {stable_mosaic.version = 11 : i64} {
  func.func @_matmul_kernel_single(%arg0: i32, %arg1: i32, %arg2: memref<32x2304xbf16, #tpu.memory_space<vmem>>, %arg3: memref<2304x512xbf16, #tpu.memory_space<vmem>>, %arg4: memref<32x512xf32, #tpu.memory_space<vmem>>) attributes {dimension_semantics = [#tpu.dimension_semantics<parallel>, #tpu.dimension_semantics<parallel>], iteration_bounds = array<i64: 1, 1>, scalar_prefetch = 0 : i64, scratch_operands = 0 : i64, tpu.core_type = #tpu.core_type<tc>, window_params = [{transform_indices = @transform_0, window_bounds = array<i64: 32, 2304>}, {transform_indices = @transform_1, window_bounds = array<i64: 2304, 512>}, {transform_indices = @transform_2, window_bounds = array<i64: 32, 512>}]} {
    %c0 = arith.constant 0 : index
    %c0_0 = arith.constant 0 : index
    %0 = vector.load %arg2[%c0, %c0_0] : memref<32x2304xbf16, #tpu.memory_space<vmem>>, vector<32x2304xbf16>
    %c0_1 = arith.constant 0 : index
    %c0_2 = arith.constant 0 : index
    %1 = vector.load %arg3[%c0_1, %c0_2] : memref<2304x512xbf16, #tpu.memory_space<vmem>>, vector<2304x512xbf16>
    %cst = arith.constant dense<0.000000e+00> : vector<32x512xf32>
    %2 = tpu.matmul %0, %1, %cst {dimension_numbers = #tpu.dot_dimension_numbers<[1], [0], [0], [1], [0, 0, 1, 1], [], []>} : vector<32x2304xbf16>, vector<2304x512xbf16>, vector<32x512xf32> -> vector<32x512xf32>
    %c0_3 = arith.constant 0 : index
    %c0_4 = arith.constant 0 : index
    %3 = vector.load %arg4[%c0_3, %c0_4] : memref<32x512xf32, #tpu.memory_space<vmem>>, vector<32x512xf32>
    tpu.vector_store %arg4[%c0_3, %c0_4], %2 {strides = array<i32>} : memref<32x512xf32, #tpu.memory_space<vmem>>, vector<32x512xf32>,
    return
  }
  func.func @transform_0(%arg0: i32, %arg1: i32) -> (i32, i32) {
    %c0_i32 = arith.constant 0 : i32
    %c0_i32_0 = arith.constant 0 : i32
    return %arg0, %c0_i32 : i32, i32
  }
  func.func @transform_1(%arg0: i32, %arg1: i32) -> (i32, i32) {
    %c0_i32 = arith.constant 0 : i32
    %c0_i32_0 = arith.constant 0 : i32
    return %c0_i32, %arg1 : i32, i32
  }
  func.func @transform_2(%arg0: i32, %arg1: i32) -> (i32, i32) {
    %c0_i32 = arith.constant 0 : i32
    return %arg0, %arg1 : i32, i32
  }
}

</mosaic_0001>

<bundles_post_ra>
// kernel: tpu_custom_call.1
= control target key start
LH: loop header
LB: loop body
LE: loop exit
PB: predicated region body
PF: predicated region fallthrough
CT: control target
= control target key end

     0   :  { %7 = vsyncpa [#allocation3], 0  ;;  %s6560_s0 = inlined_call_operand.hbm [shape: bf16[32,2304], index: 0, kind: input, shape index: {}]   ;;  %s6561_s1 = inlined_call_operand.hbm [shape: bf16[2304,512], index: 1, kind: input, shape index: {}]   ;;  %s6562_s2 = inlined_call_operand.hbm [shape: f32[32,512], index: 2, kind: output, shape index: {}]  }
   0x1   :  { %8 = vsyncpa [#allocation6], 0 }
   0x2   :  { %9 = vsyncpa [#allocation4], 0  ;;  %s6341_s9 = smov [#allocation2]  }
   0x3   :  { %s15_s10 = sshll.u32 %s6341_s9, 4  ;;  %s16_s10 = int_to_ptr.vmem [resolvable:$true] %s15_s10 }
   0x4   :  { %s6283_s11 = scalar_lea.vmem %s16_s10, 4608  ;;  %p6288_p1 = scmp.lt.s32.totalorder %s16_s10, %s16_s10 }
   0x5   :  { %p6284_p0 = scmp.ne.s32.totalorder %s16_s10, %s6283_s11  ;;  %p6289_p2 = scmp.lt.s32.totalorder %s6283_s11, %s6283_s11 }
   0x7   :  { %p6290_p3 = por %p6289_p2, %p6288_p1 }
   0x9   :  { %p6291_p4 = pnand %p6290_p3, %p6284_p0 }
   0xb   :  { %6294 = shalt.err (!%p6291_p4)
}
   0xc   :  { %s6342_s12 = smov 1152   ;;  %s6343_s13 = smov 72  }
   0xd   :  { %21 = dma.hbm_to_vmem [thread:$0]  %s6560_s0, 4608, %s16_s10, [#allocation3], %s6342_s12, %s6342_s12, %s6343_s13  }
   0xe   :  { %s6344_s16 = smov [#allocation5]  }
   0xf   :  { %s27_s17 = sshll.u32 %s6344_s16, 4  ;;  %s28_s17 = int_to_ptr.vmem [resolvable:$true] %s27_s17 }
  0x10   :  { %s6303_s18 = scalar_lea.vmem %s28_s17, 73728  ;;  %p6308_p6 = scmp.lt.s32.totalorder %s28_s17, %s28_s17 }
  0x11   :  { %p6304_p5 = scmp.ne.s32.totalorder %s28_s17, %s6303_s18  ;;  %p6309_p7 = scmp.lt.s32.totalorder %s6303_s18, %s6303_s18 }
  0x13   :  { %p6310_p8 = por %p6309_p7, %p6308_p6 }
  0x15   :  { %p6311_p9 = pnand %p6310_p8, %p6304_p5 }
  0x17   :  { %6314 = shalt.err (!%p6311_p9)
}
  0x18   :  { %s6345_s19 = smov 256   ;;  %s6346_s20 = smov 16  }
  0x19   :  { %33 = dma.hbm_to_vmem [thread:$0]  %s6561_s1, 73728, %s28_s17, [#allocation6], %s6345_s19, %s6345_s19, %s6346_s20  }
  0x1a   :  { %6335 = dma.done.wait [#allocation3], 4608  }
  0x1b   :  { %6336 = vsyncadd [#allocation3], 4294962688 }
  0x1c   :  { %6337 = dma.done.wait [#allocation6], 73728  }
  0x1d   :  { %6338 = vsyncadd [#allocation6], 4294893568  ;;  %v5321_v0 = vld [vmem:[#allocation5 + $0xe4] ss:$16 sps:$4 sm:$0xff]   ;;  %v5325_v2 = vld [vmem:[#allocation5 + $0xe0] ss:$16 sps:$4 sm:$0xff]  }
  0x1e   :  { %v5323_v1 = vld [vmem:[#allocation5 + $0x2e4] ss:$16 sps:$4 sm:$0xff]   ;;  %3712 = vmatprep.subr.bf16.mxu0 %v5321_v0  ;;  %v5326_v3 = vld [vmem:[#allocation5 + $0x2e0] ss:$16 sps:$4 sm:$0xff]   ;;  %s6347_s0 = smov [#allocation7]  }
  0x1f   :  { %3765 = vmatprep.subr.bf16.mxu1 %v5323_v1  ;;  %v5327_v4 = vld [vmem:[#allocation5 + $0xc4] ss:$16 sps:$4 sm:$0xff]   ;;  %3713 = vmatpush1.bf16.msra.mxu0 %v5325_v2  ;;  %v5331_v6 = vld [vmem:[#allocation5 + $0xc0] ss:$16 sps:$4 sm:$0xff]   ;;  %s4687_s1 = sshll.u32 %s6347_s0, 4  ;;  %s4688_s1 = int_to_ptr.vmem [resolvable:$true] %s4687_s1 }
  0x20   :  { %3766 = vmatpush1.bf16.msra.mxu1 %v5326_v3  ;;  %v5329_v5 = vld [vmem:[#allocation5 + $0x2c4] ss:$16 sps:$4 sm:$0xff]   ;;  %3714 = vmatprep.subr.bf16.mxu0 %v5327_v4  ;;  %v5332_v7 = vld [vmem:[#allocation5 + $0x2c0] ss:$16 sps:$4 sm:$0xff]   ;;  %s6315_s23 = scalar_lea.vmem %s4688_s1, 2048  ;;  %p6320_p11 = scmp.lt.s32.totalorder %s4688_s1, %s4688_s1 }
  0x21   :  { %3767 = vmatprep.subr.bf16.mxu1 %v5329_v5  ;;  %v5333_v8 = vld [vmem:[#allocation5 + $0xa4] ss:$16 sps:$4 sm:$0xff]   ;;  %v5337_v10 = vld [vmem:[#allocation5 + $0xa0] ss:$16 sps:$4 sm:$0xff]   ;;  %p6316_p10 = scmp.ne.s32.totalorder %s4688_s1, %s6315_s23  ;;  %p6321_p12 = scmp.lt.s32.totalorder %s6315_s23, %s6315_s23 }
  0x22   :  { %v5335_v9 = vld [vmem:[#allocation5 + $0x2a4] ss:$16 sps:$4 sm:$0xff]   ;;  %v5338_v11 = vld [vmem:[#allocation5 + $0x2a0] ss:$16 sps:$4 sm:$0xff]  }
  0x23   :  { %3715 = vmatpush1.bf16.msra.mxu0 %v5331_v6  ;;  %v5339_v12 = vld [vmem:[#allocation5 + $0x84] ss:$16 sps:$4 sm:$0xff]   ;;  %v5343_v14 = vld [vmem:[#allocation5 + $0x80] ss:$16 sps:$4 sm:$0xff]   ;;  %p6322_p13 = por %p6321_p12, %p6320_p11 }
  0x24   :  { %3768 = vmatpush1.bf16.msra.mxu1 %v5332_v7  ;;  %3716 = vmatprep.subr.bf16.mxu0 %v5333_v8  ;;  %v5341_v13 = vld [vmem:[#allocation5 + $0x284] ss:$16 sps:$4 sm:$0xff]   ;;  %v5344_v15 = vld [vmem:[#allocation5 + $0x280] ss:$16 sps:$4 sm:$0xff]  }
  0x25   :  { %3769 = vmatprep.subr.bf16.mxu1 %v5335_v9  ;;  %v5345_v16 = vld [vmem:[#allocation5 + $0x64] ss:$16 sps:$4 sm:$0xff]   ;;  %v5349_v18 = vld [vmem:[#allocation5 + $0x60] ss:$16 sps:$4 sm:$0xff]   ;;  %p6323_p0 = pnand %p6322_p13, %p6316_p10 }
  0x26   :  { %v5347_v17 = vld [vmem:[#allocation5 + $0x264] ss:$16 sps:$4 sm:$0xff]   ;;  %v5350_v19 = vld [vmem:[#allocation5 + $0x260] ss:$16 sps:$4 sm:$0xff]  }
  0x27   :  { %3717 = vmatpush1.bf16.msra.mxu0 %v5337_v10  ;;  %v5351_v20 = vld [vmem:[#allocation5 + $0x44] ss:$16 sps:$4 sm:$0xff]   ;;  %v5355_v22 = vld [vmem:[#allocation5 + $0x40] ss:$16 sps:$4 sm:$0xff]  }
  0x28   :  { %3770 = vmatpush1.bf16.msra.mxu1 %v5338_v11  ;;  %3718 = vmatprep.subr.bf16.mxu0 %v5339_v12  ;;  %v5353_v21 = vld [vmem:[#allocation5 + $0x244] ss:$16 sps:$4 sm:$0xff]   ;;  %v5356_v23 = vld [vmem:[#allocation5 + $0x240] ss:$16 sps:$4 sm:$0xff]  }
  0x29   :  { %3771 = vmatprep.subr.bf16.mxu1 %v5341_v13  ;;  %v5357_v24 = vld [vmem:[#allocation5 + $0x24] ss:$16 sps:$4 sm:$0xff]   ;;  %v5361_v26 = vld [vmem:[#allocation5 + $0x20] ss:$16 sps:$4 sm:$0xff]  }
  0x2a   :  { %v5359_v25 = vld [vmem:[#allocation5 + $0x224] ss:$16 sps:$4 sm:$0xff]   ;;  %v5362_v27 = vld [vmem:[#allocation5 + $0x220] ss:$16 sps:$4 sm:$0xff]  }
  0x2b   :  { %3719 = vmatpush1.bf16.msra.mxu0 %v5343_v14  ;;  %v5363_v28 = vld [vmem:[#allocation5 + $0x4] ss:$16 sps:$4 sm:$0xff]   ;;  %v5367_v30 = vld [vmem:[#allocation5] ss:$16 sps:$4 sm:$0xff]  }
  0x2c   :  { %3772 = vmatpush1.bf16.msra.mxu1 %v5344_v15  ;;  %3720 = vmatprep.subr.bf16.mxu0 %v5345_v16  ;;  %v5365_v29 = vld [vmem:[#allocation5 + $0x204] ss:$16 sps:$4 sm:$0xff]   ;;  %v5368_v31 = vld [vmem:[#allocation5 + $0x200] ss:$16 sps:$4 sm:$0xff]  }
  0x2d   :  { %3773 = vmatprep.subr.bf16.mxu1 %v5347_v17  ;;  %v5369_v32 = vld [vmem:[#allocation5 + $0x1e4] ss:$16 sps:$4 sm:$0xff]   ;;  %v5373_v34 = vld [vmem:[#allocation5 + $0x1e0] ss:$16 sps:$4 sm:$0xff]  }
  0x2e   :  { %v5371_v33 = vld [vmem:[#allocation5 + $0x3e4] ss:$16 sps:$4 sm:$0xff]   ;;  %v5374_v35 = vld [vmem:[#allocation5 + $0x3e0] ss:$16 sps:$4 sm:$0xff]  }
  0x2f   :  { %3721 = vmatpush1.bf16.msra.mxu0 %v5349_v18  ;;  %v5375_v36 = vld [vmem:[#allocation5 + $0x1c4] ss:$16 sps:$4 sm:$0xff]   ;;  %v5379_v38 = vld [vmem:[#allocation5 + $0x1c0] ss:$16 sps:$4 sm:$0xff]  }
  0x30   :  { %3774 = vmatpush1.bf16.msra.mxu1 %v5350_v19  ;;  %3722 = vmatprep.subr.bf16.mxu0 %v5351_v20  ;;  %v5377_v37 = vld [vmem:[#allocation5 + $0x3c4] ss:$16 sps:$4 sm:$0xff]   ;;  %v5380_v39 = vld [vmem:[#allocation5 + $0x3c0] ss:$16 sps:$4 sm:$0xff]  }
  0x31   :  { %3775 = vmatprep.subr.bf16.mxu1 %v5353_v21  ;;  %v5381_v40 = vld [vmem:[#allocation5 + $0x1a4] ss:$16 sps:$4 sm:$0xff]   ;;  %v5385_v42 = vld [vmem:[#allocation5 + $0x1a0] ss:$16 sps:$4 sm:$0xff]  }
  0x32   :  { %v5383_v41 = vld [vmem:[#allocation5 + $0x3a4] ss:$16 sps:$4 sm:$0xff]   ;;  %v5386_v43 = vld [vmem:[#allocation5 + $0x3a0] ss:$16 sps:$4 sm:$0xff]  }
  0x33   :  { %3723 = vmatpush1.bf16.msra.mxu0 %v5355_v22  ;;  %v5387_v44 = vld [vmem:[#allocation5 + $0x184] ss:$16 sps:$4 sm:$0xff]   ;;  %v5391_v46 = vld [vmem:[#allocation5 + $0x180] ss:$16 sps:$4 sm:$0xff]  }
  0x34   :  { %3776 = vmatpush1.bf16.msra.mxu1 %v5356_v23  ;;  %3724 = vmatprep.subr.bf16.mxu0 %v5357_v24  ;;  %v5389_v45 = vld [vmem:[#allocation5 + $0x384] ss:$16 sps:$4 sm:$0xff]   ;;  %v5392_v47 = vld [vmem:[#allocation5 + $0x380] ss:$16 sps:$4 sm:$0xff]  }
  0x35   :  { %3777 = vmatprep.subr.bf16.mxu1 %v5359_v25  ;;  %v5393_v48 = vld [vmem:[#allocation5 + $0x164] ss:$16 sps:$4 sm:$0xff]   ;;  %v5397_v52 = vld [vmem:[#allocation5 + $0x160] ss:$16 sps:$4 sm:$0xff]  }
  0x36   :  { %v5419_v49 = vld [vmem:[#allocation2 + $0x4] ss:$72 sps:$4 sm:$0xff]   ;;  %v5398_v53 = vld [vmem:[#allocation5 + $0x360] ss:$16 sps:$4 sm:$0xff]  }
  0x37   :  { %3725 = vmatpush1.bf16.msra.mxu0 %v5361_v26  ;;  %v5395_v50 = vld [vmem:[#allocation5 + $0x364] ss:$16 sps:$4 sm:$0xff]   ;;  %3744 = vmatprep.mubr.bf16.mxu0 %v5419_v49  ;;  %v5403_v56 = vld [vmem:[#allocation5 + $0x140] ss:$16 sps:$4 sm:$0xff]  }
  0x38   :  { %3778 = vmatpush1.bf16.msra.mxu1 %v5362_v27  ;;  %3726 = vmatprep.subr.bf16.mxu0 %v5363_v28  ;;  %v5422_v51 = vld [vmem:[#allocation2 + $0xc] ss:$72 sps:$4 sm:$0xff]   ;;  %v5404_v57 = vld [vmem:[#allocation5 + $0x340] ss:$16 sps:$4 sm:$0xff]   ;;  %v5503_v27 = vld [vmem:[#allocation2 + $0x9c] ss:$72 sps:$4 sm:$0xff]  }
  0x39   :  { %3779 = vmatprep.subr.bf16.mxu1 %v5365_v29  ;;  %3797 = vmatprep.mubr.bf16.mxu1 %v5422_v51  ;;  %v5399_v54 = vld [vmem:[#allocation5 + $0x144] ss:$16 sps:$4 sm:$0xff]   ;;  %v5409_v60 = vld [vmem:[#allocation5 + $0x120] ss:$16 sps:$4 sm:$0xff]  }
  0x3a   :  { %v5401_v55 = vld [vmem:[#allocation5 + $0x344] ss:$16 sps:$4 sm:$0xff]   ;;  %v5410_v61 = vld [vmem:[#allocation5 + $0x320] ss:$16 sps:$4 sm:$0xff]  }
  0x3b   :  { %3727 = vmatpush1.bf16.msra.mxu0 %v5367_v30  ;;  %v5405_v58 = vld [vmem:[#allocation5 + $0x124] ss:$16 sps:$4 sm:$0xff]   ;;  %v5415_v0 = vld [vmem:[#allocation5 + $0x100] ss:$16 sps:$4 sm:$0xff]  }
  0x3c   :  { %3780 = vmatpush1.bf16.msra.mxu1 %v5368_v31  ;;  %3728 = vmatprep.subr.bf16.mxu0 %v5369_v32  ;;  %v5407_v59 = vld [vmem:[#allocation5 + $0x324] ss:$16 sps:$4 sm:$0xff]   ;;  %v5416_v1 = vld [vmem:[#allocation5 + $0x300] ss:$16 sps:$4 sm:$0xff]  }
  0x3d   :  { %3781 = vmatprep.subr.bf16.mxu1 %v5371_v33  ;;  %v5411_v62 = vld [vmem:[#allocation5 + $0x104] ss:$16 sps:$4 sm:$0xff]   ;;  %v5417_v4 = vld [vmem:[#allocation2] ss:$72 sps:$4 sm:$0xff]   ;;  %v5505_v28 = vld [vmem:[#allocation2 + $0x90] ss:$72 sps:$4 sm:$0xff]  }
  0x3e   :  { %v5413_v63 = vld [vmem:[#allocation5 + $0x304] ss:$16 sps:$4 sm:$0xff]   ;;  %v5420_v5 = vld [vmem:[#allocation2 + $0x8] ss:$72 sps:$4 sm:$0xff]   ;;  %v5506_v29 = vld [vmem:[#allocation2 + $0x98] ss:$72 sps:$4 sm:$0xff]  }
  0x3f   :  { %3729 = vmatpush2.bf16.msra.mxu0 %v5373_v34  ;;  %v5425_v2 = vld [vmem:[#allocation5 + $0x4e4] ss:$16 sps:$4 sm:$0xff]   ;;  %v5423_v6 = vld [vmem:[#allocation5 + $0x4e0] ss:$16 sps:$4 sm:$0xff]  }
  0x40   :  { %3782 = vmatpush2.bf16.msra.mxu1 %v5374_v35  ;;  %3730 = vmatprep.subr.bf16.mxu0 %v5375_v36  ;;  %v5428_v3 = vld [vmem:[#allocation5 + $0x6e4] ss:$16 sps:$4 sm:$0xff]   ;;  %v5426_v7 = vld [vmem:[#allocation5 + $0x6e0] ss:$16 sps:$4 sm:$0xff]  }
  0x41   :  { %3783 = vmatprep.subr.bf16.mxu1 %v5377_v37  ;;  %v5431_v8 = vld [vmem:[#allocation5 + $0x4c4] ss:$16 sps:$4 sm:$0xff]   ;;  %v5429_v10 = vld [vmem:[#allocation5 + $0x4c0] ss:$16 sps:$4 sm:$0xff]  }
  0x42   :  { %v5434_v9 = vld [vmem:[#allocation5 + $0x6c4] ss:$16 sps:$4 sm:$0xff]   ;;  %v5432_v11 = vld [vmem:[#allocation5 + $0x6c0] ss:$16 sps:$4 sm:$0xff]  }
  0x43   :  { %3731 = vmatpush2.bf16.msra.mxu0 %v5379_v38  ;;  %v5437_v12 = vld [vmem:[#allocation5 + $0x4a4] ss:$16 sps:$4 sm:$0xff]   ;;  %v5435_v14 = vld [vmem:[#allocation5 + $0x4a0] ss:$16 sps:$4 sm:$0xff]  }
  0x44   :  { %3784 = vmatpush2.bf16.msra.mxu1 %v5380_v39  ;;  %3732 = vmatprep.subr.bf16.mxu0 %v5381_v40  ;;  %v5440_v13 = vld [vmem:[#allocation5 + $0x6a4] ss:$16 sps:$4 sm:$0xff]   ;;  %v5438_v15 = vld [vmem:[#allocation5 + $0x6a0] ss:$16 sps:$4 sm:$0xff]  }
  0x45   :  { %3785 = vmatprep.subr.bf16.mxu1 %v5383_v41  ;;  %v5443_v16 = vld [vmem:[#allocation5 + $0x484] ss:$16 sps:$4 sm:$0xff]   ;;  %v5441_v18 = vld [vmem:[#allocation5 + $0x480] ss:$16 sps:$4 sm:$0xff]  }
  0x46   :  { %v5446_v17 = vld [vmem:[#allocation5 + $0x684] ss:$16 sps:$4 sm:$0xff]   ;;  %v5444_v19 = vld [vmem:[#allocation5 + $0x680] ss:$16 sps:$4 sm:$0xff]  }
  0x47   :  { %3733 = vmatpush2.bf16.msra.mxu0 %v5385_v42  ;;  %v5449_v20 = vld [vmem:[#allocation5 + $0x464] ss:$16 sps:$4 sm:$0xff]   ;;  %v5447_v22 = vld [vmem:[#allocation5 + $0x460] ss:$16 sps:$4 sm:$0xff]  }
  0x48   :  { %3786 = vmatpush2.bf16.msra.mxu1 %v5386_v43  ;;  %3734 = vmatprep.subr.bf16.mxu0 %v5387_v44  ;;  %v5452_v21 = vld [vmem:[#allocation5 + $0x664] ss:$16 sps:$4 sm:$0xff]   ;;  %v5450_v23 = vld [vmem:[#allocation5 + $0x660] ss:$16 sps:$4 sm:$0xff]  }
  0x49   :  { %3787 = vmatprep.subr.bf16.mxu1 %v5389_v45  ;;  %v5455_v24 = vld [vmem:[#allocation5 + $0x444] ss:$16 sps:$4 sm:$0xff]   ;;  %v5453_v30 = vld [vmem:[#allocation5 + $0x440] ss:$16 sps:$4 sm:$0xff]  }
  0x4a   :  { %v5458_v25 = vld [vmem:[#allocation5 + $0x644] ss:$16 sps:$4 sm:$0xff]   ;;  %v5456_v31 = vld [vmem:[#allocation5 + $0x640] ss:$16 sps:$4 sm:$0xff]  }
  0x4b   :  { %3735 = vmatpush2.bf16.msra.mxu0 %v5391_v46  ;;  %v5501_v26 = vld [vmem:[#allocation2 + $0x94] ss:$72 sps:$4 sm:$0xff]   ;;  %v5459_v34 = vld [vmem:[#allocation5 + $0x420] ss:$16 sps:$4 sm:$0xff]  }
  0x4c   :  { %3788 = vmatpush2.bf16.msra.mxu1 %v5392_v47  ;;  %3736 = vmatprep.subr.bf16.mxu0 %v5393_v48  ;;  %v5461_v32 = vld [vmem:[#allocation5 + $0x424] ss:$16 sps:$4 sm:$0xff]   ;;  %v5462_v35 = vld [vmem:[#allocation5 + $0x620] ss:$16 sps:$4 sm:$0xff]  }
  0x4d   :  { %3789 = vmatprep.subr.bf16.mxu1 %v5395_v50  ;;  %v5464_v33 = vld [vmem:[#allocation5 + $0x624] ss:$16 sps:$4 sm:$0xff]   ;;  %v5465_v38 = vld [vmem:[#allocation5 + $0x400] ss:$16 sps:$4 sm:$0xff]  }
  0x4e   :  { %v5467_v36 = vld [vmem:[#allocation5 + $0x404] ss:$16 sps:$4 sm:$0xff]   ;;  %v5468_v39 = vld [vmem:[#allocation5 + $0x600] ss:$16 sps:$4 sm:$0xff]  }
  0x4f   :  { %3737 = vmatpush2.bf16.msra.mxu0 %v5397_v52  ;;  %v5470_v37 = vld [vmem:[#allocation5 + $0x604] ss:$16 sps:$4 sm:$0xff]   ;;  %v5471_v44 = vld [vmem:[#allocation5 + $0x5e0] ss:$16 sps:$4 sm:$0xff]  }
  0x50   :  { %3790 = vmatpush2.bf16.msra.mxu1 %v5398_v53  ;;  %3738 = vmatprep.subr.bf16.mxu0 %v5399_v54  ;;  %v5473_v40 = vld [vmem:[#allocation5 + $0x5e4] ss:$16 sps:$4 sm:$0xff]   ;;  %v5474_v45 = vld [vmem:[#allocation5 + $0x7e0] ss:$16 sps:$4 sm:$0xff]  }
  0x51   :  { %3791 = vmatprep.subr.bf16.mxu1 %v5401_v55  ;;  %v5527_v41 = vld [vmem:[#allocation2 + $0x14] ss:$72 sps:$4 sm:$0xff]   ;;  %v5477_v48 = vld [vmem:[#allocation5 + $0x5c0] ss:$16 sps:$4 sm:$0xff]  }
  0x52   :  { %v5476_v42 = vld [vmem:[#allocation5 + $0x7e4] ss:$16 sps:$4 sm:$0xff]   ;;  %v5480_v49 = vld [vmem:[#allocation5 + $0x7c0] ss:$16 sps:$4 sm:$0xff]  }
  0x53   :  { %3739 = vmatpush2.bf16.msra.mxu0 %v5403_v56  ;;  %v5530_v43 = vld [vmem:[#allocation2 + $0x1c] ss:$72 sps:$4 sm:$0xff]   ;;  %v5483_v52 = vld [vmem:[#allocation5 + $0x5a0] ss:$16 sps:$4 sm:$0xff]  }
  0x54   :  { %3792 = vmatpush2.bf16.msra.mxu1 %v5404_v57  ;;  %3740 = vmatprep.subr.bf16.mxu0 %v5405_v58  ;;  %v5479_v46 = vld [vmem:[#allocation5 + $0x5c4] ss:$16 sps:$4 sm:$0xff]   ;;  %v5486_v53 = vld [vmem:[#allocation5 + $0x7a0] ss:$16 sps:$4 sm:$0xff]  }
  0x55   :  { %3793 = vmatprep.subr.bf16.mxu1 %v5407_v59  ;;  %v5482_v47 = vld [vmem:[#allocation5 + $0x7c4] ss:$16 sps:$4 sm:$0xff]   ;;  %v5489_v56 = vld [vmem:[#allocation5 + $0x580] ss:$16 sps:$4 sm:$0xff]  }
  0x56   :  { %v5485_v50 = vld [vmem:[#allocation5 + $0x5a4] ss:$16 sps:$4 sm:$0xff]   ;;  %v5492_v57 = vld [vmem:[#allocation5 + $0x780] ss:$16 sps:$4 sm:$0xff]  }
  0x57   :  { %3741 = vmatpush2.bf16.msra.mxu0 %v5409_v60  ;;  %v5488_v51 = vld [vmem:[#allocation5 + $0x7a4] ss:$16 sps:$4 sm:$0xff]   ;;  %v5495_v60 = vld [vmem:[#allocation5 + $0x560] ss:$16 sps:$4 sm:$0xff]  }
  0x58   :  { %3794 = vmatpush2.bf16.msra.mxu1 %v5410_v61  ;;  %3742 = vmatprep.subr.bf16.mxu0 %v5411_v62  ;;  %v5491_v54 = vld [vmem:[#allocation5 + $0x584] ss:$16 sps:$4 sm:$0xff]   ;;  %v5498_v61 = vld [vmem:[#allocation5 + $0x760] ss:$16 sps:$4 sm:$0xff]  }
  0x59   :  { %3795 = vmatprep.subr.bf16.mxu1 %v5413_v63  ;;  %v5494_v55 = vld [vmem:[#allocation5 + $0x784] ss:$16 sps:$4 sm:$0xff]  }
  0x5a   :  { %v5497_v58 = vld [vmem:[#allocation5 + $0x564] ss:$16 sps:$4 sm:$0xff]  }
  0x5b   :  { %3743 = vmatpush2.bf16.msra.mxu0 %v5415_v0  ;;  %v5500_v59 = vld [vmem:[#allocation5 + $0x764] ss:$16 sps:$4 sm:$0xff]   ;;  %v5507_v0 = vld [vmem:[#allocation5 + $0x540] ss:$16 sps:$4 sm:$0xff]  }
  0x5c   :  { %3796 = vmatpush2.bf16.msra.mxu1 %v5416_v1  ;;  %3818 = vmatprep.subr.bf16.mxu0 %v5425_v2  ;;  %v5509_v62 = vld [vmem:[#allocation5 + $0x544] ss:$16 sps:$4 sm:$0xff]   ;;  %v5510_v1 = vld [vmem:[#allocation5 + $0x740] ss:$16 sps:$4 sm:$0xff]  }
  0x5d   :  { %3871 = vmatprep.subr.bf16.mxu1 %v5428_v3  ;;  %v5512_v63 = vld [vmem:[#allocation5 + $0x744] ss:$16 sps:$4 sm:$0xff]  }
  0x5e   :  { %3745 = vmatmul.mubr.bf16.vlgmr.msra.gmra.mxu0 %v5417_v4  ;;  %v5515_v2 = vld [vmem:[#allocation5 + $0x524] ss:$16 sps:$4 sm:$0xff]   ;;  %v5513_v4 = vld [vmem:[#allocation5 + $0x520] ss:$16 sps:$4 sm:$0xff]  }
  0x5f   :  { %3798 = vmatmul.mubr.bf16.vlgmr.msra.gmra.mxu1 %v5420_v5  ;;  %3819 = vmatpush1.bf16.msra.mxu0 %v5423_v6  ;;  %v5518_v3 = vld [vmem:[#allocation5 + $0x724] ss:$16 sps:$4 sm:$0xff]   ;;  %v5516_v5 = vld [vmem:[#allocation5 + $0x720] ss:$16 sps:$4 sm:$0xff]  }
  0x60   :  { %3872 = vmatpush1.bf16.msra.mxu1 %v5426_v7  ;;  %3820 = vmatprep.subr.bf16.mxu0 %v5431_v8  ;;  %v5521_v6 = vld [vmem:[#allocation5 + $0x504] ss:$16 sps:$4 sm:$0xff]   ;;  %v5519_v8 = vld [vmem:[#allocation5 + $0x500] ss:$16 sps:$4 sm:$0xff]  }
  0x61   :  { %3873 = vmatprep.subr.bf16.mxu1 %v5434_v9  ;;  %3754 = vmatprep.mubr.bf16.mxu0 %v5501_v26  ;;  %v5524_v7 = vld [vmem:[#allocation5 + $0x704] ss:$16 sps:$4 sm:$0xff]   ;;  %v5522_v9 = vld [vmem:[#allocation5 + $0x700] ss:$16 sps:$4 sm:$0xff]  }
  0x62   :  { %3807 = vmatprep.mubr.bf16.mxu1 %v5503_v27  ;;  %v5549_v26 = vld [vmem:[#allocation5 + $0xaa0] ss:$16 sps:$4 sm:$0xff]  }
  0x63   :  { %3821 = vmatpush1.bf16.msra.mxu0 %v5429_v10  ;;  %v5533_v10 = vld [vmem:[#allocation5 + $0x8e4] ss:$16 sps:$4 sm:$0xff]   ;;  %v5554_v27 = vld [vmem:[#allocation2 + $0xa8] ss:$72 sps:$4 sm:$0xff]  }
  0x64   :  { %3874 = vmatpush1.bf16.msra.mxu1 %v5432_v11  ;;  %3822 = vmatprep.subr.bf16.mxu0 %v5437_v12  ;;  %v5536_v11 = vld [vmem:[#allocation5 + $0xae4] ss:$16 sps:$4 sm:$0xff]   ;;  %v5525_v12 = vld [vmem:[#allocation2 + $0x10] ss:$72 sps:$4 sm:$0xff]  }
  0x65   :  { %3875 = vmatprep.subr.bf16.mxu1 %v5440_v13  ;;  %v5528_v13 = vld [vmem:[#allocation2 + $0x18] ss:$72 sps:$4 sm:$0xff]  }
  0x66   :  { %3755 = vmatmul.mubr.bf16.gmra.mxu0 %v5505_v28  ;;  %v5557_v28 = vld [vmem:[#allocation5 + $0x884] ss:$16 sps:$4 sm:$0xff]  }
  0x67   :  { %3823 = vmatpush1.bf16.msra.mxu0 %v5435_v14  ;;  %3808 = vmatmul.mubr.bf16.gmra.mxu1 %v5506_v29  ;;  %v5531_v14 = vld [vmem:[#allocation5 + $0x8e0] ss:$16 sps:$4 sm:$0xff]   ;;  %v5560_v29 = vld [vmem:[#allocation5 + $0xa84] ss:$16 sps:$4 sm:$0xff]  }
  0x68   :  { %3876 = vmatpush1.bf16.msra.mxu1 %v5438_v15  ;;  %3824 = vmatprep.subr.bf16.mxu0 %v5443_v16  ;;  %v5534_v15 = vld [vmem:[#allocation5 + $0xae0] ss:$16 sps:$4 sm:$0xff]   ;;  %v5539_v16 = vld [vmem:[#allocation5 + $0x8c4] ss:$16 sps:$4 sm:$0xff]  }
  0x69   :  { %3877 = vmatprep.subr.bf16.mxu1 %v5446_v17  ;;  %3850 = vmatprep.mubr.bf16.mxu0 %v5527_v41  ;;  %v5542_v17 = vld [vmem:[#allocation5 + $0xac4] ss:$16 sps:$4 sm:$0xff]   ;;  %v5570_v41 = vld [vmem:[#allocation5 + $0xa40] ss:$16 sps:$4 sm:$0xff]  }
  0x6a   :  { %3903 = vmatprep.mubr.bf16.mxu1 %v5530_v43  ;;  %v5578_v43 = vld [vmem:[#allocation5 + $0xa24] ss:$16 sps:$4 sm:$0xff]  }
  0x6b   :  { %3825 = vmatpush1.bf16.msra.mxu0 %v5441_v18  ;;  %v5543_v18 = vld [vmem:[#allocation2 + $0xa4] ss:$72 sps:$4 sm:$0xff]  }
  0x6c   :  { %3878 = vmatpush1.bf16.msra.mxu1 %v5444_v19  ;;  %3826 = vmatprep.subr.bf16.mxu0 %v5449_v20  ;;  %v5552_v19 = vld [vmem:[#allocation2 + $0xac] ss:$72 sps:$4 sm:$0xff]   ;;  %v5537_v20 = vld [vmem:[#allocation5 + $0x8c0] ss:$16 sps:$4 sm:$0xff]  }
  0x6d   :  { %3879 = vmatprep.subr.bf16.mxu1 %v5452_v21  ;;  %v5540_v21 = vld [vmem:[#allocation5 + $0xac0] ss:$16 sps:$4 sm:$0xff]  }
  0x6f   :  { %3827 = vmatpush1.bf16.msra.mxu0 %v5447_v22  ;;  %v5548_v22 = vld [vmem:[#allocation5 + $0x8a4] ss:$16 sps:$4 sm:$0xff]  }
  0x70   :  { %3880 = vmatpush1.bf16.msra.mxu1 %v5450_v23  ;;  %3828 = vmatprep.subr.bf16.mxu0 %v5455_v24  ;;  %v5551_v23 = vld [vmem:[#allocation5 + $0xaa4] ss:$16 sps:$4 sm:$0xff]   ;;  %v5545_v24 = vld [vmem:[#allocation2 + $0xa0] ss:$72 sps:$4 sm:$0xff]  }
  0x71   :  { %3881 = vmatprep.subr.bf16.mxu1 %v5458_v25  ;;  %v5546_v25 = vld [vmem:[#allocation5 + $0x8a0] ss:$16 sps:$4 sm:$0xff]  }
  0x73   :  { %3829 = vmatpush1.bf16.msra.mxu0 %v5453_v30  ;;  %v5555_v30 = vld [vmem:[#allocation5 + $0x880] ss:$16 sps:$4 sm:$0xff]  }
  0x74   :  { %3882 = vmatpush1.bf16.msra.mxu1 %v5456_v31  ;;  %3830 = vmatprep.subr.bf16.mxu0 %v5461_v32  ;;  %v5558_v31 = vld [vmem:[#allocation5 + $0xa80] ss:$16 sps:$4 sm:$0xff]   ;;  %v5563_v32 = vld [vmem:[#allocation5 + $0x864] ss:$16 sps:$4 sm:$0xff]  }
  0x75   :  { %3883 = vmatprep.subr.bf16.mxu1 %v5464_v33  ;;  %v5635_v33 = vld [vmem:[#allocation2 + $0x24] ss:$72 sps:$4 sm:$0xff]  }
  0x77   :  { %3831 = vmatpush1.bf16.msra.mxu0 %v5459_v34  ;;  %v5566_v34 = vld [vmem:[#allocation5 + $0xa64] ss:$16 sps:$4 sm:$0xff]  }
  0x78   :  { %3884 = vmatpush1.bf16.msra.mxu1 %v5462_v35  ;;  %3832 = vmatprep.subr.bf16.mxu0 %v5467_v36  ;;  %v5638_v35 = vld [vmem:[#allocation2 + $0x2c] ss:$72 sps:$4 sm:$0xff]   ;;  %v5561_v36 = vld [vmem:[#allocation5 + $0x860] ss:$16 sps:$4 sm:$0xff]  }
  0x79   :  { %3885 = vmatprep.subr.bf16.mxu1 %v5470_v37  ;;  %v5564_v37 = vld [vmem:[#allocation5 + $0xa60] ss:$16 sps:$4 sm:$0xff]  }
  0x7b   :  { %3833 = vmatpush1.bf16.msra.mxu0 %v5465_v38  ;;  %v5569_v38 = vld [vmem:[#allocation5 + $0x844] ss:$16 sps:$4 sm:$0xff]  }
  0x7c   :  { %3886 = vmatpush1.bf16.msra.mxu1 %v5468_v39  ;;  %3834 = vmatprep.subr.bf16.mxu0 %v5473_v40  ;;  %v5572_v39 = vld [vmem:[#allocation5 + $0xa44] ss:$16 sps:$4 sm:$0xff]   ;;  %v5567_v40 = vld [vmem:[#allocation5 + $0x840] ss:$16 sps:$4 sm:$0xff]  }
  0x7d   :  { %3887 = vmatprep.subr.bf16.mxu1 %v5476_v42  ;;  %v5575_v42 = vld [vmem:[#allocation5 + $0x824] ss:$16 sps:$4 sm:$0xff]  }
  0x7f   :  { %3835 = vmatpush2.bf16.msra.mxu0 %v5471_v44  ;;  %v5573_v44 = vld [vmem:[#allocation5 + $0x820] ss:$16 sps:$4 sm:$0xff]  }
  0x80   :  { %3888 = vmatpush2.bf16.msra.mxu1 %v5474_v45  ;;  %3836 = vmatprep.subr.bf16.mxu0 %v5479_v46  ;;  %v5576_v45 = vld [vmem:[#allocation5 + $0xa20] ss:$16 sps:$4 sm:$0xff]   ;;  %v5581_v46 = vld [vmem:[#allocation5 + $0x804] ss:$16 sps:$4 sm:$0xff]  }
  0x81   :  { %3889 = vmatprep.subr.bf16.mxu1 %v5482_v47  ;;  %v5584_v47 = vld [vmem:[#allocation5 + $0xa04] ss:$16 sps:$4 sm:$0xff]  }
  0x83   :  { %3837 = vmatpush2.bf16.msra.mxu0 %v5477_v48  ;;  %v5579_v48 = vld [vmem:[#allocation5 + $0x800] ss:$16 sps:$4 sm:$0xff]  }
  0x84   :  { %3890 = vmatpush2.bf16.msra.mxu1 %v5480_v49  ;;  %3838 = vmatprep.subr.bf16.mxu0 %v5485_v50  ;;  %v5582_v49 = vld [vmem:[#allocation5 + $0xa00] ss:$16 sps:$4 sm:$0xff]   ;;  %v5587_v50 = vld [vmem:[#allocation5 + $0x9e4] ss:$16 sps:$4 sm:$0xff]  }
  0x85   :  { %3891 = vmatprep.subr.bf16.mxu1 %v5488_v51  ;;  %v5590_v51 = vld [vmem:[#allocation5 + $0xbe4] ss:$16 sps:$4 sm:$0xff]  }
  0x87   :  { %3839 = vmatpush2.bf16.msra.mxu0 %v5483_v52  ;;  %v5585_v52 = vld [vmem:[#allocation5 + $0x9e0] ss:$16 sps:$4 sm:$0xff]  }
  0x88   :  { %3892 = vmatpush2.bf16.msra.mxu1 %v5486_v53  ;;  %3840 = vmatprep.subr.bf16.mxu0 %v5491_v54  ;;  %v5588_v53 = vld [vmem:[#allocation5 + $0xbe0] ss:$16 sps:$4 sm:$0xff]   ;;  %v5593_v54 = vld [vmem:[#allocation5 + $0x9c4] ss:$16 sps:$4 sm:$0xff]  }
  0x89   :  { %3893 = vmatprep.subr.bf16.mxu1 %v5494_v55  ;;  %v5596_v55 = vld [vmem:[#allocation5 + $0xbc4] ss:$16 sps:$4 sm:$0xff]  }
  0x8b   :  { %3841 = vmatpush2.bf16.msra.mxu0 %v5489_v56  ;;  %v5591_v56 = vld [vmem:[#allocation5 + $0x9c0] ss:$16 sps:$4 sm:$0xff]  }
  0x8c   :  { %3894 = vmatpush2.bf16.msra.mxu1 %v5492_v57  ;;  %3842 = vmatprep.subr.bf16.mxu0 %v5497_v58  ;;  %v5594_v57 = vld [vmem:[#allocation5 + $0xbc0] ss:$16 sps:$4 sm:$0xff]   ;;  %v5599_v58 = vld [vmem:[#allocation5 + $0x9a4] ss:$16 sps:$4 sm:$0xff]  }
  0x8d   :  { %3895 = vmatprep.subr.bf16.mxu1 %v5500_v59  ;;  %v5602_v59 = vld [vmem:[#allocation5 + $0xba4] ss:$16 sps:$4 sm:$0xff]  }
  0x8f   :  { %3843 = vmatpush2.bf16.msra.mxu0 %v5495_v60  ;;  %v5597_v60 = vld [vmem:[#allocation5 + $0x9a0] ss:$16 sps:$4 sm:$0xff]  }
  0x90   :  { %3896 = vmatpush2.bf16.msra.mxu1 %v5498_v61  ;;  %3844 = vmatprep.subr.bf16.mxu0 %v5509_v62  ;;  %v5600_v61 = vld [vmem:[#allocation5 + $0xba0] ss:$16 sps:$4 sm:$0xff]   ;;  %v5605_v62 = vld [vmem:[#allocation5 + $0x984] ss:$16 sps:$4 sm:$0xff]  }
  0x91   :  { %3897 = vmatprep.subr.bf16.mxu1 %v5512_v63  ;;  %v5608_v63 = vld [vmem:[#allocation5 + $0xb84] ss:$16 sps:$4 sm:$0xff]  }
  0x93   :  { %3845 = vmatpush2.bf16.msra.mxu0 %v5507_v0  ;;  %v5603_v0 = vld [vmem:[#allocation5 + $0x980] ss:$16 sps:$4 sm:$0xff]  }
  0x94   :  { %3898 = vmatpush2.bf16.msra.mxu1 %v5510_v1  ;;  %3846 = vmatprep.subr.bf16.mxu0 %v5515_v2  ;;  %v5606_v1 = vld [vmem:[#allocation5 + $0xb80] ss:$16 sps:$4 sm:$0xff]   ;;  %v5611_v2 = vld [vmem:[#allocation5 + $0x964] ss:$16 sps:$4 sm:$0xff]  }
  0x95   :  { %3899 = vmatprep.subr.bf16.mxu1 %v5518_v3  ;;  %v5614_v3 = vld [vmem:[#allocation5 + $0xb64] ss:$16 sps:$4 sm:$0xff]  }
  0x97   :  { %3847 = vmatpush2.bf16.msra.mxu0 %v5513_v4  ;;  %v5609_v4 = vld [vmem:[#allocation5 + $0x960] ss:$16 sps:$4 sm:$0xff]  }
  0x98   :  { %3900 = vmatpush2.bf16.msra.mxu1 %v5516_v5  ;;  %3848 = vmatprep.subr.bf16.mxu0 %v5521_v6  ;;  %v5612_v5 = vld [vmem:[#allocation5 + $0xb60] ss:$16 sps:$4 sm:$0xff]   ;;  %v5617_v6 = vld [vmem:[#allocation5 + $0x944] ss:$16 sps:$4 sm:$0xff]  }
  0x99   :  { %3901 = vmatprep.subr.bf16.mxu1 %v5524_v7  ;;  %v5620_v7 = vld [vmem:[#allocation5 + $0xb44] ss:$16 sps:$4 sm:$0xff]  }
  0x9b   :  { %3849 = vmatpush2.bf16.msra.mxu0 %v5519_v8  ;;  %v5615_v8 = vld [vmem:[#allocation5 + $0x940] ss:$16 sps:$4 sm:$0xff]  }
  0x9c   :  { %3902 = vmatpush2.bf16.msra.mxu1 %v5522_v9  ;;  %3924 = vmatprep.subr.bf16.mxu0 %v5533_v10  ;;  %v5618_v9 = vld [vmem:[#allocation5 + $0xb40] ss:$16 sps:$4 sm:$0xff]   ;;  %v5623_v10 = vld [vmem:[#allocation5 + $0x924] ss:$16 sps:$4 sm:$0xff]  }
  0x9d   :  { %3977 = vmatprep.subr.bf16.mxu1 %v5536_v11  ;;  %v5626_v11 = vld [vmem:[#allocation5 + $0xb24] ss:$16 sps:$4 sm:$0xff]  }
  0x9e   :  { %3851 = vmatmul.mubr.bf16.vlgmr.msra.gmra.mxu0 %v5525_v12  ;;  %v5621_v12 = vld [vmem:[#allocation5 + $0x920] ss:$16 sps:$4 sm:$0xff]  }
  0x9f   :  { %3904 = vmatmul.mubr.bf16.vlgmr.msra.gmra.mxu1 %v5528_v13  ;;  %3925 = vmatpush1.bf16.msra.mxu0 %v5531_v14  ;;  %v5624_v13 = vld [vmem:[#allocation5 + $0xb20] ss:$16 sps:$4 sm:$0xff]   ;;  %v5629_v14 = vld [vmem:[#allocation5 + $0x904] ss:$16 sps:$4 sm:$0xff]  }
  0xa0   :  { %3978 = vmatpush1.bf16.msra.mxu1 %v5534_v15  ;;  %3926 = vmatprep.subr.bf16.mxu0 %v5539_v16  ;;  %v5632_v15 = vld [vmem:[#allocation5 + $0xb04] ss:$16 sps:$4 sm:$0xff]   ;;  %v5627_v16 = vld [vmem:[#allocation5 + $0x900] ss:$16 sps:$4 sm:$0xff]  }
  0xa1   :  { %3979 = vmatprep.subr.bf16.mxu1 %v5542_v17  ;;  %3860 = vmatprep.mubr.bf16.mxu0 %v5543_v18  ;;  %v5630_v17 = vld [vmem:[#allocation5 + $0xb00] ss:$16 sps:$4 sm:$0xff]   ;;  %v5641_v18 = vld [vmem:[#allocation5 + $0xce4] ss:$16 sps:$4 sm:$0xff]  }
  0xa2   :  { %3913 = vmatprep.mubr.bf16.mxu1 %v5552_v19  ;;  %v5644_v19 = vld [vmem:[#allocation5 + $0xee4] ss:$16 sps:$4 sm:$0xff]  }
  0xa3   :  { %3927 = vmatpush1.bf16.msra.mxu0 %v5537_v20  ;;  %v5633_v20 = vld [vmem:[#allocation2 + $0x20] ss:$72 sps:$4 sm:$0xff]  }
  0xa4   :  { %3980 = vmatpush1.bf16.msra.mxu1 %v5540_v21  ;;  %3928 = vmatprep.subr.bf16.mxu0 %v5548_v22  ;;  %v5636_v21 = vld [vmem:[#allocation2 + $0x28] ss:$72 sps:$4 sm:$0xff]  }
  0xa5   :  { %3981 = vmatprep.subr.bf16.mxu1 %v5551_v23  ;;  %v5639_v22 = vld [vmem:[#allocation5 + $0xce0] ss:$16 sps:$4 sm:$0xff]  }
  0xa6   :  { %3861 = vmatmul.mubr.bf16.gmra.mxu0 %v5545_v24  ;;  %v5642_v23 = vld [vmem:[#allocation5 + $0xee0] ss:$16 sps:$4 sm:$0xff]   ;;  %v5647_v24 = vld [vmem:[#allocation5 + $0xcc4] ss:$16 sps:$4 sm:$0xff]  }
  0xa7   :  { %3914 = vmatmul.mubr.bf16.gmra.mxu1 %v5554_v27  ;;  %3929 = vmatpush1.bf16.msra.mxu0 %v5546_v25  ;;  %v5650_v25 = vld [vmem:[#allocation5 + $0xec4] ss:$16 sps:$4 sm:$0xff]  }
  0xa8   :  { %3982 = vmatpush1.bf16.msra.mxu1 %v5549_v26  ;;  %3930 = vmatprep.subr.bf16.mxu0 %v5557_v28  ;;  %v5651_v26 = vld [vmem:[#allocation2 + $0xb4] ss:$72 sps:$4 sm:$0xff]   ;;  %v5645_v28 = vld [vmem:[#allocation5 + $0xcc0] ss:$16 sps:$4 sm:$0xff]  }
  0xa9   :  { %3983 = vmatprep.subr.bf16.mxu1 %v5560_v29  ;;  %3956 = vmatprep.mubr.bf16.mxu0 %v5635_v33  ;;  %v5660_v27 = vld [vmem:[#allocation2 + $0xbc] ss:$72 sps:$4 sm:$0xff]   ;;  %v5648_v29 = vld [vmem:[#allocation5 + $0xec0] ss:$16 sps:$4 sm:$0xff]  }
  0xaa   :  { %4009 = vmatprep.mubr.bf16.mxu1 %v5638_v35  ;;  %v5654_v33 = vld [vmem:[#allocation5 + $0xca0] ss:$16 sps:$4 sm:$0xff]  }
  0xab   :  { %3931 = vmatpush1.bf16.msra.mxu0 %v5555_v30  ;;  %v5656_v30 = vld [vmem:[#allocation5 + $0xca4] ss:$16 sps:$4 sm:$0xff]   ;;  %v5662_v35 = vld [vmem:[#allocation2 + $0xb8] ss:$72 sps:$4 sm:$0xff]  }
  0xac   :  { %3984 = vmatpush1.bf16.msra.mxu1 %v5558_v31  ;;  %3932 = vmatprep.subr.bf16.mxu0 %v5563_v32  ;;  %v5659_v31 = vld [vmem:[#allocation5 + $0xea4] ss:$16 sps:$4 sm:$0xff]   ;;  %v5653_v32 = vld [vmem:[#allocation2 + $0xb0] ss:$72 sps:$4 sm:$0xff]  }
  0xad   :  { %3985 = vmatprep.subr.bf16.mxu1 %v5566_v34  ;;  %v5657_v34 = vld [vmem:[#allocation5 + $0xea0] ss:$16 sps:$4 sm:$0xff]  }
  0xaf   :  { %3933 = vmatpush1.bf16.msra.mxu0 %v5561_v36  ;;  %v5665_v36 = vld [vmem:[#allocation5 + $0xc84] ss:$16 sps:$4 sm:$0xff]  }
  0xb0   :  { %3986 = vmatpush1.bf16.msra.mxu1 %v5564_v37  ;;  %3934 = vmatprep.subr.bf16.mxu0 %v5569_v38  ;;  %v5668_v37 = vld [vmem:[#allocation5 + $0xe84] ss:$16 sps:$4 sm:$0xff]  }
  0xb1   :  { %3987 = vmatprep.subr.bf16.mxu1 %v5572_v39  ;;  %v5743_v38 = vld [vmem:[#allocation2 + $0x34] ss:$72 sps:$4 sm:$0xff]  }
  0xb2   :  { %v5746_v39 = vld [vmem:[#allocation2 + $0x3c] ss:$72 sps:$4 sm:$0xff]  }
  0xb3   :  { %3935 = vmatpush1.bf16.msra.mxu0 %v5567_v40  ;;  %v5663_v40 = vld [vmem:[#allocation5 + $0xc80] ss:$16 sps:$4 sm:$0xff]  }
  0xb4   :  { %3988 = vmatpush1.bf16.msra.mxu1 %v5570_v41  ;;  %3936 = vmatprep.subr.bf16.mxu0 %v5575_v42  ;;  %v5666_v41 = vld [vmem:[#allocation5 + $0xe80] ss:$16 sps:$4 sm:$0xff]   ;;  %v5671_v42 = vld [vmem:[#allocation5 + $0xc64] ss:$16 sps:$4 sm:$0xff]  }
  0xb5   :  { %3989 = vmatprep.subr.bf16.mxu1 %v5578_v43  ;;  %v5674_v43 = vld [vmem:[#allocation5 + $0xe64] ss:$16 sps:$4 sm:$0xff]  }
  0xb7   :  { %3937 = vmatpush1.bf16.msra.mxu0 %v5573_v44  ;;  %v5669_v44 = vld [vmem:[#allocation5 + $0xc60] ss:$16 sps:$4 sm:$0xff]  }
  0xb8   :  { %3990 = vmatpush1.bf16.msra.mxu1 %v5576_v45  ;;  %3938 = vmatprep.subr.bf16.mxu0 %v5581_v46  ;;  %v5672_v45 = vld [vmem:[#allocation5 + $0xe60] ss:$16 sps:$4 sm:$0xff]   ;;  %v5677_v46 = vld [vmem:[#allocation5 + $0xc44] ss:$16 sps:$4 sm:$0xff]  }
  0xb9   :  { %3991 = vmatprep.subr.bf16.mxu1 %v5584_v47  ;;  %v5680_v47 = vld [vmem:[#allocation5 + $0xe44] ss:$16 sps:$4 sm:$0xff]  }
  0xbb   :  { %3939 = vmatpush1.bf16.msra.mxu0 %v5579_v48  ;;  %v5675_v48 = vld [vmem:[#allocation5 + $0xc40] ss:$16 sps:$4 sm:$0xff]  }
  0xbc   :  { %3992 = vmatpush1.bf16.msra.mxu1 %v5582_v49  ;;  %3940 = vmatprep.subr.bf16.mxu0 %v5587_v50  ;;  %v5678_v49 = vld [vmem:[#allocation5 + $0xe40] ss:$16 sps:$4 sm:$0xff]   ;;  %v5683_v50 = vld [vmem:[#allocation5 + $0xc24] ss:$16 sps:$4 sm:$0xff]  }
  0xbd   :  { %3993 = vmatprep.subr.bf16.mxu1 %v5590_v51  ;;  %v5686_v51 = vld [vmem:[#allocation5 + $0xe24] ss:$16 sps:$4 sm:$0xff]  }
  0xbf   :  { %3941 = vmatpush2.bf16.msra.mxu0 %v5585_v52  ;;  %v5681_v52 = vld [vmem:[#allocation5 + $0xc20] ss:$16 sps:$4 sm:$0xff]  }
  0xc0   :  { %3994 = vmatpush2.bf16.msra.mxu1 %v5588_v53  ;;  %3942 = vmatprep.subr.bf16.mxu0 %v5593_v54  ;;  %v5684_v53 = vld [vmem:[#allocation5 + $0xe20] ss:$16 sps:$4 sm:$0xff]   ;;  %v5689_v54 = vld [vmem:[#allocation5 + $0xc04] ss:$16 sps:$4 sm:$0xff]  }
  0xc1   :  { %3995 = vmatprep.subr.bf16.mxu1 %v5596_v55  ;;  %v5692_v55 = vld [vmem:[#allocation5 + $0xe04] ss:$16 sps:$4 sm:$0xff]  }
  0xc3   :  { %3943 = vmatpush2.bf16.msra.mxu0 %v5591_v56  ;;  %v5687_v56 = vld [vmem:[#allocation5 + $0xc00] ss:$16 sps:$4 sm:$0xff]  }
  0xc4   :  { %3996 = vmatpush2.bf16.msra.mxu1 %v5594_v57  ;;  %3944 = vmatprep.subr.bf16.mxu0 %v5599_v58  ;;  %v5690_v57 = vld [vmem:[#allocation5 + $0xe00] ss:$16 sps:$4 sm:$0xff]   ;;  %v5695_v58 = vld [vmem:[#allocation5 + $0xde4] ss:$16 sps:$4 sm:$0xff]  }
  0xc5   :  { %3997 = vmatprep.subr.bf16.mxu1 %v5602_v59  ;;  %v5698_v59 = vld [vmem:[#allocation5 + $0xfe4] ss:$16 sps:$4 sm:$0xff]  }
  0xc7   :  { %3945 = vmatpush2.bf16.msra.mxu0 %v5597_v60  ;;  %v5693_v60 = vld [vmem:[#allocation5 + $0xde0] ss:$16 sps:$4 sm:$0xff]  }
  0xc8   :  { %3998 = vmatpush2.bf16.msra.mxu1 %v5600_v61  ;;  %3946 = vmatprep.subr.bf16.mxu0 %v5605_v62  ;;  %v5696_v61 = vld [vmem:[#allocation5 + $0xfe0] ss:$16 sps:$4 sm:$0xff]   ;;  %v5701_v62 = vld [vmem:[#allocation5 + $0xdc4] ss:$16 sps:$4 sm:$0xff]  }
  0xc9   :  { %3999 = vmatprep.subr.bf16.mxu1 %v5608_v63  ;;  %v5704_v63 = vld [vmem:[#allocation5 + $0xfc4] ss:$16 sps:$4 sm:$0xff]  }
  0xcb   :  { %3947 = vmatpush2.bf16.msra.mxu0 %v5603_v0  ;;  %v5699_v0 = vld [vmem:[#allocation5 + $0xdc0] ss:$16 sps:$4 sm:$0xff]  }
  0xcc   :  { %4000 = vmatpush2.bf16.msra.mxu1 %v5606_v1  ;;  %3948 = vmatprep.subr.bf16.mxu0 %v5611_v2  ;;  %v5702_v1 = vld [vmem:[#allocation5 + $0xfc0] ss:$16 sps:$4 sm:$0xff]   ;;  %v5707_v2 = vld [vmem:[#allocation5 + $0xda4] ss:$16 sps:$4 sm:$0xff]  }
  0xcd   :  { %4001 = vmatprep.subr.bf16.mxu1 %v5614_v3  ;;  %v5710_v3 = vld [vmem:[#allocation5 + $0xfa4] ss:$16 sps:$4 sm:$0xff]  }
  0xcf   :  { %3949 = vmatpush2.bf16.msra.mxu0 %v5609_v4  ;;  %v5705_v4 = vld [vmem:[#allocation5 + $0xda0] ss:$16 sps:$4 sm:$0xff]  }
  0xd0   :  { %4002 = vmatpush2.bf16.msra.mxu1 %v5612_v5  ;;  %3950 = vmatprep.subr.bf16.mxu0 %v5617_v6  ;;  %v5708_v5 = vld [vmem:[#allocation5 + $0xfa0] ss:$16 sps:$4 sm:$0xff]   ;;  %v5713_v6 = vld [vmem:[#allocation5 + $0xd84] ss:$16 sps:$4 sm:$0xff]  }
  0xd1   :  { %4003 = vmatprep.subr.bf16.mxu1 %v5620_v7  ;;  %v5716_v7 = vld [vmem:[#allocation5 + $0xf84] ss:$16 sps:$4 sm:$0xff]  }
  0xd3   :  { %3951 = vmatpush2.bf16.msra.mxu0 %v5615_v8  ;;  %v5711_v8 = vld [vmem:[#allocation5 + $0xd80] ss:$16 sps:$4 sm:$0xff]  }
  0xd4   :  { %4004 = vmatpush2.bf16.msra.mxu1 %v5618_v9  ;;  %3952 = vmatprep.subr.bf16.mxu0 %v5623_v10  ;;  %v5714_v9 = vld [vmem:[#allocation5 + $0xf80] ss:$16 sps:$4 sm:$0xff]   ;;  %v5719_v10 = vld [vmem:[#allocation5 + $0xd64] ss:$16 sps:$4 sm:$0xff]  }
  0xd5   :  { %4005 = vmatprep.subr.bf16.mxu1 %v5626_v11  ;;  %v5722_v11 = vld [vmem:[#allocation5 + $0xf64] ss:$16 sps:$4 sm:$0xff]  }
  0xd7   :  { %3953 = vmatpush2.bf16.msra.mxu0 %v5621_v12  ;;  %v5717_v12 = vld [vmem:[#allocation5 + $0xd60] ss:$16 sps:$4 sm:$0xff]  }
  0xd8   :  { %4006 = vmatpush2.bf16.msra.mxu1 %v5624_v13  ;;  %3954 = vmatprep.subr.bf16.mxu0 %v5629_v14  ;;  %v5720_v13 = vld [vmem:[#allocation5 + $0xf60] ss:$16 sps:$4 sm:$0xff]   ;;  %v5725_v14 = vld [vmem:[#allocation5 + $0xd44] ss:$16 sps:$4 sm:$0xff]  }
  0xd9   :  { %4007 = vmatprep.subr.bf16.mxu1 %v5632_v15  ;;  %v5728_v15 = vld [vmem:[#allocation5 + $0xf44] ss:$16 sps:$4 sm:$0xff]  }
  0xdb   :  { %3955 = vmatpush2.bf16.msra.mxu0 %v5627_v16  ;;  %v5723_v16 = vld [vmem:[#allocation5 + $0xd40] ss:$16 sps:$4 sm:$0xff]  }
  0xdc   :  { %4008 = vmatpush2.bf16.msra.mxu1 %v5630_v17  ;;  %4030 = vmatprep.subr.bf16.mxu0 %v5641_v18  ;;  %v5726_v17 = vld [vmem:[#allocation5 + $0xf40] ss:$16 sps:$4 sm:$0xff]   ;;  %v5731_v18 = vld [vmem:[#allocation5 + $0xd24] ss:$16 sps:$4 sm:$0xff]  }
  0xdd   :  { %4083 = vmatprep.subr.bf16.mxu1 %v5644_v19  ;;  %v5734_v19 = vld [vmem:[#allocation5 + $0xf24] ss:$16 sps:$4 sm:$0xff]  }
  0xde   :  { %3957 = vmatmul.mubr.bf16.vlgmr.msra.gmra.mxu0 %v5633_v20  ;;  %v5729_v20 = vld [vmem:[#allocation5 + $0xd20] ss:$16 sps:$4 sm:$0xff]  }
  0xdf   :  { %4010 = vmatmul.mubr.bf16.vlgmr.msra.gmra.mxu1 %v5636_v21  ;;  %4031 = vmatpush1.bf16.msra.mxu0 %v5639_v22  ;;  %v5732_v21 = vld [vmem:[#allocation5 + $0xf20] ss:$16 sps:$4 sm:$0xff]   ;;  %v5737_v22 = vld [vmem:[#allocation5 + $0xd04] ss:$16 sps:$4 sm:$0xff]  }
  0xe0   :  { %4084 = vmatpush1.bf16.msra.mxu1 %v5642_v23  ;;  %4032 = vmatprep.subr.bf16.mxu0 %v5647_v24  ;;  %v5740_v23 = vld [vmem:[#allocation5 + $0xf04] ss:$16 sps:$4 sm:$0xff]   ;;  %v5735_v24 = vld [vmem:[#allocation5 + $0xd00] ss:$16 sps:$4 sm:$0xff]  }
  0xe1   :  { %4085 = vmatprep.subr.bf16.mxu1 %v5650_v25  ;;  %3966 = vmatprep.mubr.bf16.mxu0 %v5651_v26  ;;  %v5738_v25 = vld [vmem:[#allocation5 + $0xf00] ss:$16 sps:$4 sm:$0xff]   ;;  %v5749_v26 = vld [vmem:[#allocation5 + $0x10e4] ss:$16 sps:$4 sm:$0xff]  }
  0xe2   :  { %4019 = vmatprep.mubr.bf16.mxu1 %v5660_v27  ;;  %v5752_v27 = vld [vmem:[#allocation5 + $0xec] ss:$16 sps:$4 sm:$0xff]  }
  0xe3   :  { %4033 = vmatpush1.bf16.msra.mxu0 %v5645_v28  ;;  %v5741_v28 = vld [vmem:[#allocation2 + $0x30] ss:$72 sps:$4 sm:$0xff]  }
  0xe4   :  { %4086 = vmatpush1.bf16.msra.mxu1 %v5648_v29  ;;  %4034 = vmatprep.subr.bf16.mxu0 %v5656_v30  ;;  %v5744_v29 = vld [vmem:[#allocation2 + $0x38] ss:$72 sps:$4 sm:$0xff]  }
  0xe5   :  { %4087 = vmatprep.subr.bf16.mxu1 %v5659_v31  ;;  %v5747_v30 = vld [vmem:[#allocation5 + $0x10e0] ss:$16 sps:$4 sm:$0xff]   ;;  %v5750_v31 = vld [vmem:[#allocation5 + $0xe8] ss:$16 sps:$4 sm:$0xff]  }
  0xe6   :  { %3967 = vmatmul.mubr.bf16.gmra.mxu0 %v5653_v32  ;;  %v5755_v32 = vld [vmem:[#allocation5 + $0x10c4] ss:$16 sps:$4 sm:$0xff]  }
  0xe7   :  { %4020 = vmatmul.mubr.bf16.gmra.mxu1 %v5662_v35  ;;  %4035 = vmatpush1.bf16.msra.mxu0 %v5654_v33  ;;  %v5758_v33 = vld [vmem:[#allocation5 + $0xcc] ss:$16 sps:$4 sm:$0xff]  }
  0xe8   :  { %4088 = vmatpush1.bf16.msra.mxu1 %v5657_v34  ;;  %4036 = vmatprep.subr.bf16.mxu0 %v5665_v36  ;;  %v5759_v34 = vld [vmem:[#allocation2 + $0xc4] ss:$72 sps:$4 sm:$0xff]   ;;  %v5753_v36 = vld [vmem:[#allocation5 + $0x10c0] ss:$16 sps:$4 sm:$0xff]  }
  0xe9   :  { %4089 = vmatprep.subr.bf16.mxu1 %v5668_v37  ;;  %4062 = vmatprep.mubr.bf16.mxu0 %v5743_v38  ;;  %v5768_v35 = vld [vmem:[#allocation2 + $0xcc] ss:$72 sps:$4 sm:$0xff]   ;;  %v5756_v37 = vld [vmem:[#allocation5 + $0xc8] ss:$16 sps:$4 sm:$0xff]  }
  0xea   :  { %4115 = vmatprep.mubr.bf16.mxu1 %v5746_v39  ;;  %v5764_v38 = vld [vmem:[#allocation5 + $0x10a4] ss:$16 sps:$4 sm:$0xff]   ;;  %v5767_v39 = vld [vmem:[#allocation5 + $0xac] ss:$16 sps:$4 sm:$0xff]  }
  0xeb   :  { %4037 = vmatpush1.bf16.msra.mxu0 %v5663_v40  ;;  %v5761_v40 = vld [vmem:[#allocation2 + $0xc0] ss:$72 sps:$4 sm:$0xff]  }
  0xec   :  { %4090 = vmatpush1.bf16.msra.mxu1 %v5666_v41  ;;  %4038 = vmatprep.subr.bf16.mxu0 %v5671_v42  ;;  %v5762_v41 = vld [vmem:[#allocation5 + $0x10a0] ss:$16 sps:$4 sm:$0xff]   ;;  %v5765_v42 = vld [vmem:[#allocation5 + $0xa8] ss:$16 sps:$4 sm:$0xff]  }
  0xed   :  { %4091 = vmatprep.subr.bf16.mxu1 %v5674_v43  ;;  %v5770_v43 = vld [vmem:[#allocation2 + $0xc8] ss:$72 sps:$4 sm:$0xff]  }
  0xef   :  { %4039 = vmatpush1.bf16.msra.mxu0 %v5669_v44  ;;  %v5773_v44 = vld [vmem:[#allocation5 + $0x1084] ss:$16 sps:$4 sm:$0xff]  }
  0xf0   :  { %4092 = vmatpush1.bf16.msra.mxu1 %v5672_v45  ;;  %4040 = vmatprep.subr.bf16.mxu0 %v5677_v46  ;;  %v5776_v45 = vld [vmem:[#allocation5 + $0x8c] ss:$16 sps:$4 sm:$0xff]  }
  0xf1   :  { %4093 = vmatprep.subr.bf16.mxu1 %v5680_v47  ;;  %v5851_v46 = vld [vmem:[#allocation2 + $0x44] ss:$72 sps:$4 sm:$0xff]   ;;  %v5771_v47 = vld [vmem:[#allocation5 + $0x1080] ss:$16 sps:$4 sm:$0xff]  }
  0xf3   :  { %4041 = vmatpush1.bf16.msra.mxu0 %v5675_v48  ;;  %v5774_v48 = vld [vmem:[#allocation5 + $0x88] ss:$16 sps:$4 sm:$0xff]  }
  0xf4   :  { %4094 = vmatpush1.bf16.msra.mxu1 %v5678_v49  ;;  %4042 = vmatprep.subr.bf16.mxu0 %v5683_v50  ;;  %v5779_v49 = vld [vmem:[#allocation5 + $0x1064] ss:$16 sps:$4 sm:$0xff]   ;;  %v5782_v50 = vld [vmem:[#allocation5 + $0x6c] ss:$16 sps:$4 sm:$0xff]  }
  0xf5   :  { %4095 = vmatprep.subr.bf16.mxu1 %v5686_v51  ;;  %v6239_v51 = vld [vmem:[#allocation2 + $0x4] ss:$72 sps:$4 sm:$0xff]  }
  0xf7   :  { %4043 = vmatpush1.bf16.msra.mxu0 %v5681_v52  ;;  %v5777_v52 = vld [vmem:[#allocation5 + $0x1060] ss:$16 sps:$4 sm:$0xff]  }
  0xf8   :  { %4096 = vmatpush1.bf16.msra.mxu1 %v5684_v53  ;;  %4044 = vmatprep.subr.bf16.mxu0 %v5689_v54  ;;  %v5780_v53 = vld [vmem:[#allocation5 + $0x68] ss:$16 sps:$4 sm:$0xff]   ;;  %v5785_v54 = vld [vmem:[#allocation5 + $0x1044] ss:$16 sps:$4 sm:$0xff]  }
  0xf9   :  { %4097 = vmatprep.subr.bf16.mxu1 %v5692_v55  ;;  %v5788_v55 = vld [vmem:[#allocation5 + $0x4c] ss:$16 sps:$4 sm:$0xff]  }
  0xfb   :  { %4045 = vmatpush1.bf16.msra.mxu0 %v5687_v56  ;;  %v5783_v56 = vld [vmem:[#allocation5 + $0x1040] ss:$16 sps:$4 sm:$0xff]  }
  0xfc   :  { %4098 = vmatpush1.bf16.msra.mxu1 %v5690_v57  ;;  %4046 = vmatprep.subr.bf16.mxu0 %v5695_v58  ;;  %v5786_v57 = vld [vmem:[#allocation5 + $0x48] ss:$16 sps:$4 sm:$0xff]   ;;  %v5791_v58 = vld [vmem:[#allocation5 + $0x1024] ss:$16 sps:$4 sm:$0xff]  }
  0xfd   :  { %4099 = vmatprep.subr.bf16.mxu1 %v5698_v59  ;;  %v5794_v59 = vld [vmem:[#allocation5 + $0x2c] ss:$16 sps:$4 sm:$0xff]  }
  0xff   :  { %4047 = vmatpush2.bf16.msra.mxu0 %v5693_v60  ;;  %v5789_v60 = vld [vmem:[#allocation5 + $0x1020] ss:$16 sps:$4 sm:$0xff]  }
 0x100   :  { %4100 = vmatpush2.bf16.msra.mxu1 %v5696_v61  ;;  %4048 = vmatprep.subr.bf16.mxu0 %v5701_v62  ;;  %v5792_v61 = vld [vmem:[#allocation5 + $0x28] ss:$16 sps:$4 sm:$0xff]   ;;  %v5797_v62 = vld [vmem:[#allocation5 + $0x1004] ss:$16 sps:$4 sm:$0xff]  }
 0x101   :  { %4101 = vmatprep.subr.bf16.mxu1 %v5704_v63  ;;  %v5800_v63 = vld [vmem:[#allocation5 + $0xc] ss:$16 sps:$4 sm:$0xff]  }
 0x103   :  { %4049 = vmatpush2.bf16.msra.mxu0 %v5699_v0  ;;  %v5795_v0 = vld [vmem:[#allocation5 + $0x1000] ss:$16 sps:$4 sm:$0xff]  }
 0x104   :  { %4102 = vmatpush2.bf16.msra.mxu1 %v5702_v1  ;;  %4050 = vmatprep.subr.bf16.mxu0 %v5707_v2  ;;  %v5798_v1 = vld [vmem:[#allocation5 + $0x8] ss:$16 sps:$4 sm:$0xff]   ;;  %v5803_v2 = vld [vmem:[#allocation5 + $0x11e4] ss:$16 sps:$4 sm:$0xff]  }
 0x105   :  { %4103 = vmatprep.subr.bf16.mxu1 %v5710_v3  ;;  %v5806_v3 = vld [vmem:[#allocation5 + $0x1ec] ss:$16 sps:$4 sm:$0xff]  }
 0x107   :  { %4051 = vmatpush2.bf16.msra.mxu0 %v5705_v4  ;;  %v5801_v4 = vld [vmem:[#allocation5 + $0x11e0] ss:$16 sps:$4 sm:$0xff]  }
 0x108   :  { %4104 = vmatpush2.bf16.msra.mxu1 %v5708_v5  ;;  %4052 = vmatprep.subr.bf16.mxu0 %v5713_v6  ;;  %v5804_v5 = vld [vmem:[#allocation5 + $0x1e8] ss:$16 sps:$4 sm:$0xff]   ;;  %v5809_v6 = vld [vmem:[#allocation5 + $0x11c4] ss:$16 sps:$4 sm:$0xff]  }
 0x109   :  { %4105 = vmatprep.subr.bf16.mxu1 %v5716_v7  ;;  %v5812_v7 = vld [vmem:[#allocation5 + $0x1cc] ss:$16 sps:$4 sm:$0xff]  }
 0x10b   :  { %4053 = vmatpush2.bf16.msra.mxu0 %v5711_v8  ;;  %v5807_v8 = vld [vmem:[#allocation5 + $0x11c0] ss:$16 sps:$4 sm:$0xff]  }
 0x10c   :  { %4106 = vmatpush2.bf16.msra.mxu1 %v5714_v9  ;;  %4054 = vmatprep.subr.bf16.mxu0 %v5719_v10  ;;  %v5810_v9 = vld [vmem:[#allocation5 + $0x1c8] ss:$16 sps:$4 sm:$0xff]   ;;  %v5815_v10 = vld [vmem:[#allocation5 + $0x11a4] ss:$16 sps:$4 sm:$0xff]  }
 0x10d   :  { %4107 = vmatprep.subr.bf16.mxu1 %v5722_v11  ;;  %v5818_v11 = vld [vmem:[#allocation5 + $0x1ac] ss:$16 sps:$4 sm:$0xff]  }
 0x10f   :  { %4055 = vmatpush2.bf16.msra.mxu0 %v5717_v12  ;;  %v5813_v12 = vld [vmem:[#allocation5 + $0x11a0] ss:$16 sps:$4 sm:$0xff]  }
 0x110   :  { %4108 = vmatpush2.bf16.msra.mxu1 %v5720_v13  ;;  %4056 = vmatprep.subr.bf16.mxu0 %v5725_v14  ;;  %v5816_v13 = vld [vmem:[#allocation5 + $0x1a8] ss:$16 sps:$4 sm:$0xff]   ;;  %v5821_v14 = vld [vmem:[#allocation5 + $0x1184] ss:$16 sps:$4 sm:$0xff]  }
 0x111   :  { %4109 = vmatprep.subr.bf16.mxu1 %v5728_v15  ;;  %v5824_v15 = vld [vmem:[#allocation5 + $0x18c] ss:$16 sps:$4 sm:$0xff]  }
 0x113   :  { %4057 = vmatpush2.bf16.msra.mxu0 %v5723_v16  ;;  %v5819_v16 = vld [vmem:[#allocation5 + $0x1180] ss:$16 sps:$4 sm:$0xff]  }
 0x114   :  { %4110 = vmatpush2.bf16.msra.mxu1 %v5726_v17  ;;  %4058 = vmatprep.subr.bf16.mxu0 %v5731_v18  ;;  %v5822_v17 = vld [vmem:[#allocation5 + $0x188] ss:$16 sps:$4 sm:$0xff]   ;;  %v5827_v18 = vld [vmem:[#allocation5 + $0x1164] ss:$16 sps:$4 sm:$0xff]  }
 0x115   :  { %4111 = vmatprep.subr.bf16.mxu1 %v5734_v19  ;;  %v5830_v19 = vld [vmem:[#allocation5 + $0x16c] ss:$16 sps:$4 sm:$0xff]  }
 0x117   :  { %4059 = vmatpush2.bf16.msra.mxu0 %v5729_v20  ;;  %v5825_v20 = vld [vmem:[#allocation5 + $0x1160] ss:$16 sps:$4 sm:$0xff]  }
 0x118   :  { %4112 = vmatpush2.bf16.msra.mxu1 %v5732_v21  ;;  %4060 = vmatprep.subr.bf16.mxu0 %v5737_v22  ;;  %v5828_v21 = vld [vmem:[#allocation5 + $0x168] ss:$16 sps:$4 sm:$0xff]   ;;  %v5833_v22 = vld [vmem:[#allocation5 + $0x1144] ss:$16 sps:$4 sm:$0xff]  }
 0x119   :  { %4113 = vmatprep.subr.bf16.mxu1 %v5740_v23  ;;  %v5836_v23 = vld [vmem:[#allocation5 + $0x14c] ss:$16 sps:$4 sm:$0xff]  }
 0x11b   :  { %4061 = vmatpush2.bf16.msra.mxu0 %v5735_v24  ;;  %v5831_v24 = vld [vmem:[#allocation5 + $0x1140] ss:$16 sps:$4 sm:$0xff]  }
 0x11c   :  { %4114 = vmatpush2.bf16.msra.mxu1 %v5738_v25  ;;  %4136 = vmatprep.subr.bf16.mxu0 %v5749_v26  ;;  %v5834_v25 = vld [vmem:[#allocation5 + $0x148] ss:$16 sps:$4 sm:$0xff]   ;;  %v5839_v26 = vld [vmem:[#allocation5 + $0x1124] ss:$16 sps:$4 sm:$0xff]  }
 0x11d   :  { %4189 = vmatprep.subr.bf16.mxu1 %v5752_v27  ;;  %v5842_v27 = vld [vmem:[#allocation5 + $0x12c] ss:$16 sps:$4 sm:$0xff]  }
 0x11e   :  { %4063 = vmatmul.mubr.bf16.vlgmr.msra.gmra.mxu0 %v5741_v28  ;;  %v5837_v28 = vld [vmem:[#allocation5 + $0x1120] ss:$16 sps:$4 sm:$0xff]  }
 0x11f   :  { %4116 = vmatmul.mubr.bf16.vlgmr.msra.gmra.mxu1 %v5744_v29  ;;  %4137 = vmatpush1.bf16.msra.mxu0 %v5747_v30  ;;  %v5840_v29 = vld [vmem:[#allocation5 + $0x128] ss:$16 sps:$4 sm:$0xff]   ;;  %v5845_v30 = vld [vmem:[#allocation5 + $0x1104] ss:$16 sps:$4 sm:$0xff]  }
 0x120   :  { %4190 = vmatpush1.bf16.msra.mxu1 %v5750_v31  ;;  %4138 = vmatprep.subr.bf16.mxu0 %v5755_v32  ;;  %v5848_v31 = vld [vmem:[#allocation5 + $0x10c] ss:$16 sps:$4 sm:$0xff]   ;;  %v5843_v32 = vld [vmem:[#allocation5 + $0x1100] ss:$16 sps:$4 sm:$0xff]  }
 0x121   :  { %4191 = vmatprep.subr.bf16.mxu1 %v5758_v33  ;;  %4072 = vmatprep.mubr.bf16.mxu0 %v5759_v34  ;;  %v5846_v33 = vld [vmem:[#allocation5 + $0x108] ss:$16 sps:$4 sm:$0xff]   ;;  %v5854_v34 = vld [vmem:[#allocation5 + $0x2ec] ss:$16 sps:$4 sm:$0xff]  }
 0x122   :  { %4125 = vmatprep.mubr.bf16.mxu1 %v5768_v35  ;;  %v5857_v35 = vld [vmem:[#allocation5 + $0x4ec] ss:$16 sps:$4 sm:$0xff]  }
 0x123   :  { %4139 = vmatpush1.bf16.msra.mxu0 %v5753_v36  ;;  %v5849_v36 = vld [vmem:[#allocation2 + $0x40] ss:$72 sps:$4 sm:$0xff]  }
 0x124   :  { %4192 = vmatpush1.bf16.msra.mxu1 %v5756_v37  ;;  %4140 = vmatprep.subr.bf16.mxu0 %v5764_v38  ;;  %v5852_v37 = vld [vmem:[#allocation5 + $0x2e8] ss:$16 sps:$4 sm:$0xff]  }
 0x125   :  { %4193 = vmatprep.subr.bf16.mxu1 %v5767_v39  ;;  %v5855_v38 = vld [vmem:[#allocation5 + $0x4e8] ss:$16 sps:$4 sm:$0xff]   ;;  %v5860_v39 = vld [vmem:[#allocation5 + $0x2cc] ss:$16 sps:$4 sm:$0xff]  }
 0x126   :  { %4073 = vmatmul.mubr.bf16.gmra.mxu0 %v5761_v40  ;;  %v5863_v40 = vld [vmem:[#allocation5 + $0x4cc] ss:$16 sps:$4 sm:$0xff]  }
 0x127   :  { %4126 = vmatmul.mubr.bf16.gmra.mxu1 %v5770_v43  ;;  %4141 = vmatpush1.bf16.msra.mxu0 %v5762_v41  ;;  %v5864_v41 = vld [vmem:[#allocation2 + $0xd4] ss:$72 sps:$4 sm:$0xff]   ;;  %v5858_v43 = vld [vmem:[#allocation5 + $0x2c8] ss:$16 sps:$4 sm:$0xff]  }
 0x128   :  { %4194 = vmatpush1.bf16.msra.mxu1 %v5765_v42  ;;  %4142 = vmatprep.subr.bf16.mxu0 %v5773_v44  ;;  %v6240_v42 = vld [vmem:[#allocation2] ss:$72 sps:$4 sm:$0xff]  }
 0x129   :  { %4195 = vmatprep.subr.bf16.mxu1 %v5776_v45  ;;  %4168 = vmatprep.mubr.bf16.mxu0 %v5851_v46  ;;  %v5861_v44 = vld [vmem:[#allocation5 + $0x4c8] ss:$16 sps:$4 sm:$0xff]   ;;  %v5869_v45 = vld [vmem:[#allocation5 + $0x2ac] ss:$16 sps:$4 sm:$0xff]  }
 0x12a   :  { %4221 = vmatprep.mubr.bf16.mxu1 %v6239_v51  ;;  %v5872_v46 = vld [vmem:[#allocation5 + $0x4ac] ss:$16 sps:$4 sm:$0xff]  }
 0x12b   :  { %4143 = vmatpush1.bf16.msra.mxu0 %v5771_v47  ;;  %v5866_v47 = vld [vmem:[#allocation2 + $0xd0] ss:$72 sps:$4 sm:$0xff]   ;;  %v5875_v51 = vld [vmem:[#allocation5 + $0x28c] ss:$16 sps:$4 sm:$0xff]  }
 0x12c   :  { %4196 = vmatpush1.bf16.msra.mxu1 %v5774_v48  ;;  %4144 = vmatprep.subr.bf16.mxu0 %v5779_v49  ;;  %v6241_v48 = vld [vmem:[#allocation2 + $0x94] ss:$72 sps:$4 sm:$0xff]   ;;  %v5867_v49 = vld [vmem:[#allocation5 + $0x2a8] ss:$16 sps:$4 sm:$0xff]  }
 0x12d   :  { %4197 = vmatprep.subr.bf16.mxu1 %v5782_v50  ;;  %v5870_v50 = vld [vmem:[#allocation5 + $0x4a8] ss:$16 sps:$4 sm:$0xff]  }
 0x12f   :  { %4145 = vmatpush1.bf16.msra.mxu0 %v5777_v52  ;;  %v5878_v52 = vld [vmem:[#allocation5 + $0x48c] ss:$16 sps:$4 sm:$0xff]  }
 0x130   :  { %4198 = vmatpush1.bf16.msra.mxu1 %v5780_v53  ;;  %4146 = vmatprep.subr.bf16.mxu0 %v5785_v54  ;;  %v5873_v53 = vld [vmem:[#allocation5 + $0x288] ss:$16 sps:$4 sm:$0xff]  }
 0x131   :  { %4199 = vmatprep.subr.bf16.mxu1 %v5788_v55  ;;  %v5876_v54 = vld [vmem:[#allocation5 + $0x488] ss:$16 sps:$4 sm:$0xff]  }
 0x132   :  { %v6242_v55 = vld [vmem:[#allocation2 + $0x90] ss:$72 sps:$4 sm:$0xff]  }
 0x133   :  { %4147 = vmatpush1.bf16.msra.mxu0 %v5783_v56  ;;  %v5881_v56 = vld [vmem:[#allocation5 + $0x26c] ss:$16 sps:$4 sm:$0xff]  }
 0x134   :  { %4200 = vmatpush1.bf16.msra.mxu1 %v5786_v57  ;;  %4148 = vmatprep.subr.bf16.mxu0 %v5791_v58  ;;  %v5884_v57 = vld [vmem:[#allocation5 + $0x46c] ss:$16 sps:$4 sm:$0xff]   ;;  %v5879_v58 = vld [vmem:[#allocation5 + $0x268] ss:$16 sps:$4 sm:$0xff]  }
 0x135   :  { %4201 = vmatprep.subr.bf16.mxu1 %v5794_v59  ;;  %v5882_v59 = vld [vmem:[#allocation5 + $0x468] ss:$16 sps:$4 sm:$0xff]  }
 0x137   :  { %4149 = vmatpush1.bf16.msra.mxu0 %v5789_v60  ;;  %v6243_v60 = vld [vmem:[#allocation2 + $0xc] ss:$72 sps:$4 sm:$0xff]  }
 0x138   :  { %4202 = vmatpush1.bf16.msra.mxu1 %v5792_v61  ;;  %4150 = vmatprep.subr.bf16.mxu0 %v5797_v62  ;;  %v6244_v61 = vld [vmem:[#allocation2 + $0x14] ss:$72 sps:$4 sm:$0xff]  }
 0x139   :  { %4203 = vmatprep.subr.bf16.mxu1 %v5800_v63  ;;  %v5887_v62 = vld [vmem:[#allocation5 + $0x24c] ss:$16 sps:$4 sm:$0xff]  }
 0x13a   :  { %v5890_v63 = vld [vmem:[#allocation5 + $0x44c] ss:$16 sps:$4 sm:$0xff]  }
 0x13b   :  { %4151 = vmatpush1.bf16.msra.mxu0 %v5795_v0  ;;  %v5885_v0 = vld [vmem:[#allocation5 + $0x248] ss:$16 sps:$4 sm:$0xff]  }
 0x13c   :  { %4204 = vmatpush1.bf16.msra.mxu1 %v5798_v1  ;;  %4152 = vmatprep.subr.bf16.mxu0 %v5803_v2  ;;  %v5888_v1 = vld [vmem:[#allocation5 + $0x448] ss:$16 sps:$4 sm:$0xff]   ;;  %v5893_v2 = vld [vmem:[#allocation5 + $0x22c] ss:$16 sps:$4 sm:$0xff]  }
 0x13d   :  { %4205 = vmatprep.subr.bf16.mxu1 %v5806_v3  ;;  %v5896_v3 = vld [vmem:[#allocation5 + $0x42c] ss:$16 sps:$4 sm:$0xff]  }
 0x13f   :  { %4153 = vmatpush2.bf16.msra.mxu0 %v5801_v4  ;;  %v5891_v4 = vld [vmem:[#allocation5 + $0x228] ss:$16 sps:$4 sm:$0xff]  }
 0x140   :  { %4206 = vmatpush2.bf16.msra.mxu1 %v5804_v5  ;;  %4154 = vmatprep.subr.bf16.mxu0 %v5809_v6  ;;  %v5894_v5 = vld [vmem:[#allocation5 + $0x428] ss:$16 sps:$4 sm:$0xff]   ;;  %v5899_v6 = vld [vmem:[#allocation5 + $0x20c] ss:$16 sps:$4 sm:$0xff]  }
 0x141   :  { %4207 = vmatprep.subr.bf16.mxu1 %v5812_v7  ;;  %v5902_v7 = vld [vmem:[#allocation5 + $0x40c] ss:$16 sps:$4 sm:$0xff]  }
 0x143   :  { %4155 = vmatpush2.bf16.msra.mxu0 %v5807_v8  ;;  %v5897_v8 = vld [vmem:[#allocation5 + $0x208] ss:$16 sps:$4 sm:$0xff]  }
 0x144   :  { %4208 = vmatpush2.bf16.msra.mxu1 %v5810_v9  ;;  %4156 = vmatprep.subr.bf16.mxu0 %v5815_v10  ;;  %v5900_v9 = vld [vmem:[#allocation5 + $0x408] ss:$16 sps:$4 sm:$0xff]   ;;  %v5905_v10 = vld [vmem:[#allocation5 + $0x3ec] ss:$16 sps:$4 sm:$0xff]  }
 0x145   :  { %4209 = vmatprep.subr.bf16.mxu1 %v5818_v11  ;;  %v5908_v11 = vld [vmem:[#allocation5 + $0x5ec] ss:$16 sps:$4 sm:$0xff]  }
 0x147   :  { %4157 = vmatpush2.bf16.msra.mxu0 %v5813_v12  ;;  %v5903_v12 = vld [vmem:[#allocation5 + $0x3e8] ss:$16 sps:$4 sm:$0xff]  }
 0x148   :  { %4210 = vmatpush2.bf16.msra.mxu1 %v5816_v13  ;;  %4158 = vmatprep.subr.bf16.mxu0 %v5821_v14  ;;  %v5906_v13 = vld [vmem:[#allocation5 + $0x5e8] ss:$16 sps:$4 sm:$0xff]   ;;  %v5911_v14 = vld [vmem:[#allocation5 + $0x3cc] ss:$16 sps:$4 sm:$0xff]  }
 0x149   :  { %4211 = vmatprep.subr.bf16.mxu1 %v5824_v15  ;;  %v5914_v15 = vld [vmem:[#allocation5 + $0x5cc] ss:$16 sps:$4 sm:$0xff]  }
 0x14b   :  { %4159 = vmatpush2.bf16.msra.mxu0 %v5819_v16  ;;  %v5909_v16 = vld [vmem:[#allocation5 + $0x3c8] ss:$16 sps:$4 sm:$0xff]  }
 0x14c   :  { %4212 = vmatpush2.bf16.msra.mxu1 %v5822_v17  ;;  %4160 = vmatprep.subr.bf16.mxu0 %v5827_v18  ;;  %v5912_v17 = vld [vmem:[#allocation5 + $0x5c8] ss:$16 sps:$4 sm:$0xff]   ;;  %v5917_v18 = vld [vmem:[#allocation5 + $0x3ac] ss:$16 sps:$4 sm:$0xff]  }
 0x14d   :  { %4213 = vmatprep.subr.bf16.mxu1 %v5830_v19  ;;  %v5920_v19 = vld [vmem:[#allocation5 + $0x5ac] ss:$16 sps:$4 sm:$0xff]  }
 0x14f   :  { %4161 = vmatpush2.bf16.msra.mxu0 %v5825_v20  ;;  %v5915_v20 = vld [vmem:[#allocation5 + $0x3a8] ss:$16 sps:$4 sm:$0xff]  }
 0x150   :  { %4214 = vmatpush2.bf16.msra.mxu1 %v5828_v21  ;;  %4162 = vmatprep.subr.bf16.mxu0 %v5833_v22  ;;  %v5918_v21 = vld [vmem:[#allocation5 + $0x5a8] ss:$16 sps:$4 sm:$0xff]   ;;  %v5923_v22 = vld [vmem:[#allocation5 + $0x38c] ss:$16 sps:$4 sm:$0xff]  }
 0x151   :  { %4215 = vmatprep.subr.bf16.mxu1 %v5836_v23  ;;  %v5926_v23 = vld [vmem:[#allocation5 + $0x58c] ss:$16 sps:$4 sm:$0xff]  }
 0x153   :  { %4163 = vmatpush2.bf16.msra.mxu0 %v5831_v24  ;;  %v5921_v24 = vld [vmem:[#allocation5 + $0x388] ss:$16 sps:$4 sm:$0xff]  }
 0x154   :  { %4216 = vmatpush2.bf16.msra.mxu1 %v5834_v25  ;;  %4164 = vmatprep.subr.bf16.mxu0 %v5839_v26  ;;  %v5924_v25 = vld [vmem:[#allocation5 + $0x588] ss:$16 sps:$4 sm:$0xff]   ;;  %v5929_v26 = vld [vmem:[#allocation5 + $0x36c] ss:$16 sps:$4 sm:$0xff]  }
 0x155   :  { %4217 = vmatprep.subr.bf16.mxu1 %v5842_v27  ;;  %v5932_v27 = vld [vmem:[#allocation5 + $0x56c] ss:$16 sps:$4 sm:$0xff]  }
 0x157   :  { %4165 = vmatpush2.bf16.msra.mxu0 %v5837_v28  ;;  %v5927_v28 = vld [vmem:[#allocation5 + $0x368] ss:$16 sps:$4 sm:$0xff]  }
 0x158   :  { %4218 = vmatpush2.bf16.msra.mxu1 %v5840_v29  ;;  %4166 = vmatprep.subr.bf16.mxu0 %v5845_v30  ;;  %v5930_v29 = vld [vmem:[#allocation5 + $0x568] ss:$16 sps:$4 sm:$0xff]   ;;  %v5935_v30 = vld [vmem:[#allocation5 + $0x34c] ss:$16 sps:$4 sm:$0xff]  }
 0x159   :  { %4219 = vmatprep.subr.bf16.mxu1 %v5848_v31  ;;  %v5938_v31 = vld [vmem:[#allocation5 + $0x54c] ss:$16 sps:$4 sm:$0xff]  }
 0x15b   :  { %4167 = vmatpush2.bf16.msra.mxu0 %v5843_v32  ;;  %v5933_v32 = vld [vmem:[#allocation5 + $0x348] ss:$16 sps:$4 sm:$0xff]  }
 0x15c   :  { %4220 = vmatpush2.bf16.msra.mxu1 %v5846_v33  ;;  %4242 = vmatprep.subr.bf16.mxu0 %v5854_v34  ;;  %v5936_v33 = vld [vmem:[#allocation5 + $0x548] ss:$16 sps:$4 sm:$0xff]   ;;  %v5941_v34 = vld [vmem:[#allocation5 + $0x32c] ss:$16 sps:$4 sm:$0xff]  }
 0x15d   :  { %4295 = vmatprep.subr.bf16.mxu1 %v5857_v35  ;;  %v5944_v35 = vld [vmem:[#allocation5 + $0x52c] ss:$16 sps:$4 sm:$0xff]  }
 0x15e   :  { %4169 = vmatmul.mubr.bf16.vlgmr.msra.gmra.mxu0 %v5849_v36  ;;  %v5939_v36 = vld [vmem:[#allocation5 + $0x328] ss:$16 sps:$4 sm:$0xff]  }
 0x15f   :  { %4222 = vmatmul.mubr.bf16.vlgmr.msra.gmra.mxu1 %v6240_v42  ;;  %4243 = vmatpush1.bf16.msra.mxu0 %v5852_v37  ;;  %v5942_v37 = vld [vmem:[#allocation5 + $0x528] ss:$16 sps:$4 sm:$0xff]   ;;  %v5953_v42 = vld [vmem:[#allocation5 + $0x6ec] ss:$16 sps:$4 sm:$0xff]  }
 0x160   :  { %4296 = vmatpush1.bf16.msra.mxu1 %v5855_v38  ;;  %4244 = vmatprep.subr.bf16.mxu0 %v5860_v39  ;;  %v5947_v38 = vld [vmem:[#allocation5 + $0x30c] ss:$16 sps:$4 sm:$0xff]  }
 0x161   :  { %4297 = vmatprep.subr.bf16.mxu1 %v5863_v40  ;;  %4178 = vmatprep.mubr.bf16.mxu0 %v5864_v41  ;;  %v5950_v39 = vld [vmem:[#allocation5 + $0x50c] ss:$16 sps:$4 sm:$0xff]   ;;  %v5945_v40 = vld [vmem:[#allocation5 + $0x308] ss:$16 sps:$4 sm:$0xff]  }
 0x162   :  { %4231 = vmatprep.mubr.bf16.mxu1 %v6241_v48  ;;  %v5948_v41 = vld [vmem:[#allocation5 + $0x508] ss:$16 sps:$4 sm:$0xff]  }
 0x163   :  { %4245 = vmatpush1.bf16.msra.mxu0 %v5858_v43  ;;  %v5956_v43 = vld [vmem:[#allocation5 + $0x8ec] ss:$16 sps:$4 sm:$0xff]   ;;  %v6245_v48 = vld [vmem:[#allocation2 + $0x8] ss:$72 sps:$4 sm:$0xff]  }
 0x164   :  { %4298 = vmatpush1.bf16.msra.mxu1 %v5861_v44  ;;  %4246 = vmatprep.subr.bf16.mxu0 %v5869_v45  ;;  %v5951_v44 = vld [vmem:[#allocation5 + $0x6e8] ss:$16 sps:$4 sm:$0xff]  }
 0x165   :  { %4299 = vmatprep.subr.bf16.mxu1 %v5872_v46  ;;  %v5954_v45 = vld [vmem:[#allocation5 + $0x8e8] ss:$16 sps:$4 sm:$0xff]   ;;  %v5959_v46 = vld [vmem:[#allocation5 + $0x6cc] ss:$16 sps:$4 sm:$0xff]  }
 0x166   :  { %4179 = vmatmul.mubr.bf16.gmra.mxu0 %v5866_v47  ;;  %v5962_v47 = vld [vmem:[#allocation5 + $0x8cc] ss:$16 sps:$4 sm:$0xff]  }
 0x167   :  { %4232 = vmatmul.mubr.bf16.gmra.mxu1 %v6242_v55  ;;  %4247 = vmatpush1.bf16.msra.mxu0 %v5867_v49  ;;  %v6246_v49 = vld [vmem:[#allocation2 + $0x10] ss:$72 sps:$4 sm:$0xff]   ;;  %v6248_v55 = vld [vmem:[#allocation2 + $0xa4] ss:$72 sps:$4 sm:$0xff]  }
 0x168   :  { %4300 = vmatpush1.bf16.msra.mxu1 %v5870_v50  ;;  %4248 = vmatprep.subr.bf16.mxu0 %v5875_v51  ;;  %v5957_v50 = vld [vmem:[#allocation5 + $0x6c8] ss:$16 sps:$4 sm:$0xff]  }
 0x169   :  { %4301 = vmatprep.subr.bf16.mxu1 %v5878_v52  ;;  %4274 = vmatprep.mubr.bf16.mxu0 %v6243_v60  ;;  %v5960_v51 = vld [vmem:[#allocation5 + $0x8c8] ss:$16 sps:$4 sm:$0xff]   ;;  %v5965_v52 = vld [vmem:[#allocation5 + $0x6ac] ss:$16 sps:$4 sm:$0xff]  }
 0x16a   :  { %4327 = vmatprep.mubr.bf16.mxu1 %v6244_v61  ;;  %v6249_v60 = vld [vmem:[#allocation2 + $0x98] ss:$72 sps:$4 sm:$0xff]  }
 0x16b   :  { %4249 = vmatpush1.bf16.msra.mxu0 %v5873_v53  ;;  %v5968_v53 = vld [vmem:[#allocation5 + $0x8ac] ss:$16 sps:$4 sm:$0xff]   ;;  %v6250_v61 = vld [vmem:[#allocation2 + $0xa0] ss:$72 sps:$4 sm:$0xff]  }
 0x16c   :  { %4302 = vmatpush1.bf16.msra.mxu1 %v5876_v54  ;;  %4250 = vmatprep.subr.bf16.mxu0 %v5881_v56  ;;  %v6247_v54 = vld [vmem:[#allocation2 + $0x9c] ss:$72 sps:$4 sm:$0xff]   ;;  %v5963_v56 = vld [vmem:[#allocation5 + $0x6a8] ss:$16 sps:$4 sm:$0xff]  }
 0x16d   :  { %4303 = vmatprep.subr.bf16.mxu1 %v5884_v57  ;;  %v5966_v57 = vld [vmem:[#allocation5 + $0x8a8] ss:$16 sps:$4 sm:$0xff]  }
 0x16f   :  { %4251 = vmatpush1.bf16.msra.mxu0 %v5879_v58  ;;  %v5971_v58 = vld [vmem:[#allocation5 + $0x68c] ss:$16 sps:$4 sm:$0xff]  }
 0x170   :  { %4304 = vmatpush1.bf16.msra.mxu1 %v5882_v59  ;;  %4252 = vmatprep.subr.bf16.mxu0 %v5887_v62  ;;  %v5974_v59 = vld [vmem:[#allocation5 + $0x88c] ss:$16 sps:$4 sm:$0xff]   ;;  %v5969_v62 = vld [vmem:[#allocation5 + $0x688] ss:$16 sps:$4 sm:$0xff]  }
 0x171   :  { %4305 = vmatprep.subr.bf16.mxu1 %v5890_v63  ;;  %v5972_v63 = vld [vmem:[#allocation5 + $0x888] ss:$16 sps:$4 sm:$0xff]  }
 0x173   :  { %4253 = vmatpush1.bf16.msra.mxu0 %v5885_v0  ;;  %v6371_v0 = vpop.f32.mrf.mxu0 }
 0x174   :  { %4306 = vmatpush1.bf16.msra.mxu1 %v5888_v1  ;;  %4254 = vmatprep.subr.bf16.mxu0 %v5893_v2  ;;  %v5977_v1 = vld [vmem:[#allocation5 + $0x66c] ss:$16 sps:$4 sm:$0xff]  }
 0x175   :  { %4307 = vmatprep.subr.bf16.mxu1 %v5896_v3  ;;  %v5980_v2 = vld [vmem:[#allocation5 + $0x86c] ss:$16 sps:$4 sm:$0xff]  }
 0x176   :  { %v6251_v3 = vld [vmem:[#allocation2 + $0x1c] ss:$72 sps:$4 sm:$0xff]  }
 0x177   :  { %4255 = vmatpush1.bf16.msra.mxu0 %v5891_v4  ;;  %v6252_v4 = vld [vmem:[#allocation2 + $0x24] ss:$72 sps:$4 sm:$0xff]  }
 0x178   :  { %4308 = vmatpush1.bf16.msra.mxu1 %v5894_v5  ;;  %4256 = vmatprep.subr.bf16.mxu0 %v5899_v6  ;;  %v5975_v5 = vld [vmem:[#allocation5 + $0x668] ss:$16 sps:$4 sm:$0xff]  }
 0x179   :  { %4309 = vmatprep.subr.bf16.mxu1 %v5902_v7  ;;  %v5978_v6 = vld [vmem:[#allocation5 + $0x868] ss:$16 sps:$4 sm:$0xff]   ;;  %v6373_v7 = vpop.f32.mrf.mxu0 }
 0x17b   :  { %4257 = vmatpush1.bf16.msra.mxu0 %v5897_v8  ;;  %v5983_v8 = vld [vmem:[#allocation5 + $0x64c] ss:$16 sps:$4 sm:$0xff]  }
 0x17c   :  { %4310 = vmatpush1.bf16.msra.mxu1 %v5900_v9  ;;  %4258 = vmatprep.subr.bf16.mxu0 %v5905_v10  ;;  %v5986_v9 = vld [vmem:[#allocation5 + $0x84c] ss:$16 sps:$4 sm:$0xff]   ;;  %v5981_v10 = vld [vmem:[#allocation5 + $0x648] ss:$16 sps:$4 sm:$0xff]  }
 0x17d   :  { %4311 = vmatprep.subr.bf16.mxu1 %v5908_v11  ;;  %v5984_v11 = vld [vmem:[#allocation5 + $0x848] ss:$16 sps:$4 sm:$0xff]  }
 0x17f   :  { %4259 = vmatpush2.bf16.msra.mxu0 %v5903_v12  ;;  %v6375_v12 = vpop.f32.mrf.mxu0 }
 0x180   :  { %4312 = vmatpush2.bf16.msra.mxu1 %v5906_v13  ;;  %4260 = vmatprep.subr.bf16.mxu0 %v5911_v14  ;;  %v5989_v13 = vld [vmem:[#allocation5 + $0x62c] ss:$16 sps:$4 sm:$0xff]  }
 0x181   :  { %4313 = vmatprep.subr.bf16.mxu1 %v5914_v15  ;;  %v5992_v14 = vld [vmem:[#allocation5 + $0x82c] ss:$16 sps:$4 sm:$0xff]   ;;  %v5987_v15 = vld [vmem:[#allocation5 + $0x628] ss:$16 sps:$4 sm:$0xff]  }
 0x183   :  { %4261 = vmatpush2.bf16.msra.mxu0 %v5909_v16  ;;  %v5990_v16 = vld [vmem:[#allocation5 + $0x828] ss:$16 sps:$4 sm:$0xff]  }
 0x184   :  { %4314 = vmatpush2.bf16.msra.mxu1 %v5912_v17  ;;  %4262 = vmatprep.subr.bf16.mxu0 %v5917_v18  ;;  %v6377_v17 = vpop.f32.mrf.mxu0  ;;  %v5995_v18 = vld [vmem:[#allocation5 + $0x60c] ss:$16 sps:$4 sm:$0xff]  }
 0x185   :  { %4315 = vmatprep.subr.bf16.mxu1 %v5920_v19  ;;  %v5998_v19 = vld [vmem:[#allocation5 + $0x80c] ss:$16 sps:$4 sm:$0xff]  }
 0x187   :  { %4263 = vmatpush2.bf16.msra.mxu0 %v5915_v20  ;;  %v6379_v20 = vpop.f32.mrf.mxu0 }
 0x188   :  { %4316 = vmatpush2.bf16.msra.mxu1 %v5918_v21  ;;  %4264 = vmatprep.subr.bf16.mxu0 %v5923_v22  ;;  %v5993_v21 = vld [vmem:[#allocation5 + $0x608] ss:$16 sps:$4 sm:$0xff]  }
 0x189   :  { %4317 = vmatprep.subr.bf16.mxu1 %v5926_v23  ;;  %v5996_v22 = vld [vmem:[#allocation5 + $0x808] ss:$16 sps:$4 sm:$0xff]   ;;  %v6001_v23 = vld [vmem:[#allocation5 + $0x7ec] ss:$16 sps:$4 sm:$0xff]  }
 0x18b   :  { %4265 = vmatpush2.bf16.msra.mxu0 %v5921_v24  ;;  %v6004_v24 = vld [vmem:[#allocation5 + $0x9ec] ss:$16 sps:$4 sm:$0xff]  }
 0x18c   :  { %4318 = vmatpush2.bf16.msra.mxu1 %v5924_v25  ;;  %4266 = vmatprep.subr.bf16.mxu0 %v5929_v26  ;;  %v6381_v25 = vpop.f32.mrf.mxu1  ;;  %v6383_v26 = vpop.f32.mrf.mxu0 }
 0x18d   :  { %4319 = vmatprep.subr.bf16.mxu1 %v5932_v27  ;;  %v5999_v27 = vld [vmem:[#allocation5 + $0x7e8] ss:$16 sps:$4 sm:$0xff]  }
 0x18f   :  { %4267 = vmatpush2.bf16.msra.mxu0 %v5927_v28  ;;  %v6002_v28 = vld [vmem:[#allocation5 + $0x9e8] ss:$16 sps:$4 sm:$0xff]  }
 0x190   :  { %4320 = vmatpush2.bf16.msra.mxu1 %v5930_v29  ;;  %4268 = vmatprep.subr.bf16.mxu0 %v5935_v30  ;;  %v6007_v29 = vld [vmem:[#allocation5 + $0x7cc] ss:$16 sps:$4 sm:$0xff]  }
 0x191   :  { %4321 = vmatprep.subr.bf16.mxu1 %v5938_v31  ;;  %v6010_v30 = vld [vmem:[#allocation5 + $0x9cc] ss:$16 sps:$4 sm:$0xff]   ;;  %v6385_v31 = vpop.f32.mrf.mxu1 }
 0x193   :  { %4269 = vmatpush2.bf16.msra.mxu0 %v5933_v32  ;;  %v6387_v32 = vpop.f32.mrf.mxu0 }
 0x194   :  { %4322 = vmatpush2.bf16.msra.mxu1 %v5936_v33  ;;  %4270 = vmatprep.subr.bf16.mxu0 %v5941_v34  ;;  %v6005_v33 = vld [vmem:[#allocation5 + $0x7c8] ss:$16 sps:$4 sm:$0xff]  }
 0x195   :  { %4323 = vmatprep.subr.bf16.mxu1 %v5944_v35  ;;  %v6008_v34 = vld [vmem:[#allocation5 + $0x9c8] ss:$16 sps:$4 sm:$0xff]   ;;  %v6013_v35 = vld [vmem:[#allocation5 + $0x7ac] ss:$16 sps:$4 sm:$0xff]  }
 0x197   :  { %4271 = vmatpush2.bf16.msra.mxu0 %v5939_v36  ;;  %v6016_v36 = vld [vmem:[#allocation5 + $0x9ac] ss:$16 sps:$4 sm:$0xff]  }
 0x198   :  { %4324 = vmatpush2.bf16.msra.mxu1 %v5942_v37  ;;  %4272 = vmatprep.subr.bf16.mxu0 %v5947_v38  ;;  %v6389_v37 = vpop.f32.mrf.mxu1  ;;  %v6391_v38 = vpop.f32.mrf.mxu0 }
 0x199   :  { %4325 = vmatprep.subr.bf16.mxu1 %v5950_v39  ;;  %v6011_v39 = vld [vmem:[#allocation5 + $0x7a8] ss:$16 sps:$4 sm:$0xff]  }
 0x19b   :  { %4273 = vmatpush2.bf16.msra.mxu0 %v5945_v40  ;;  %v6014_v40 = vld [vmem:[#allocation5 + $0x9a8] ss:$16 sps:$4 sm:$0xff]  }
 0x19c   :  { %4326 = vmatpush2.bf16.msra.mxu1 %v5948_v41  ;;  %4348 = vmatprep.subr.bf16.mxu0 %v5953_v42  ;;  %v6393_v41 = vpop.f32.mrf.mxu0  ;;  %v6019_v42 = vld [vmem:[#allocation5 + $0x78c] ss:$16 sps:$4 sm:$0xff]  }
 0x19d   :  { %4401 = vmatprep.subr.bf16.mxu1 %v5956_v43  ;;  %v6022_v43 = vld [vmem:[#allocation5 + $0x98c] ss:$16 sps:$4 sm:$0xff]  }
 0x19e   :  { %4275 = vmatmul.mubr.bf16.vlgmr.msra.gmra.mxu0 %v6245_v48  ;;  %v6399_v48 = vpop.f32.mrf.mxu0 }
 0x19f   :  { %4328 = vmatmul.mubr.bf16.vlgmr.msra.gmra.mxu1 %v6246_v49  ;;  %4349 = vmatpush1.bf16.msra.mxu0 %v5951_v44  ;;  %v6395_v44 = vpop.f32.mrf.mxu1  ;;  %v6025_v49 = vld [vmem:[#allocation5 + $0x76c] ss:$16 sps:$4 sm:$0xff]  }
 0x1a0   :  { %4402 = vmatpush1.bf16.msra.mxu1 %v5954_v45  ;;  %4350 = vmatprep.subr.bf16.mxu0 %v5959_v46  ;;  %v6017_v45 = vld [vmem:[#allocation5 + $0x788] ss:$16 sps:$4 sm:$0xff]  }
 0x1a1   :  { %4403 = vmatprep.subr.bf16.mxu1 %v5962_v47  ;;  %4284 = vmatprep.mubr.bf16.mxu0 %v6247_v54  ;;  %v6020_v46 = vld [vmem:[#allocation5 + $0x988] ss:$16 sps:$4 sm:$0xff]   ;;  %v6397_v47 = vpop.f32.mrf.mxu1  ;;  %v6403_v54 = vpop.f32.mrf.mxu0 }
 0x1a2   :  { %4337 = vmatprep.mubr.bf16.mxu1 %v6248_v55  ;;  %v6031_v55 = vld [vmem:[#allocation5 + $0x74c] ss:$16 sps:$4 sm:$0xff]  }
 0x1a3   :  { %4351 = vmatpush1.bf16.msra.mxu0 %v5957_v50  ;;  %v6028_v50 = vld [vmem:[#allocation5 + $0x96c] ss:$16 sps:$4 sm:$0xff]  }
 0x1a4   :  { %4404 = vmatpush1.bf16.msra.mxu1 %v5960_v51  ;;  %4352 = vmatprep.subr.bf16.mxu0 %v5965_v52  ;;  %v6023_v51 = vld [vmem:[#allocation5 + $0x768] ss:$16 sps:$4 sm:$0xff]  }
 0x1a5   :  { %4405 = vmatprep.subr.bf16.mxu1 %v5968_v53  ;;  %v6026_v52 = vld [vmem:[#allocation5 + $0x968] ss:$16 sps:$4 sm:$0xff]   ;;  %v6401_v53 = vpop.f32.mrf.mxu1 }
 0x1a6   :  { %4285 = vmatmul.mubr.bf16.gmra.mxu0 %v6249_v60  ;;  %v6407_v60 = vpop.f32.mrf.mxu0 }
 0x1a7   :  { %4338 = vmatmul.mubr.bf16.gmra.mxu1 %v6250_v61  ;;  %4353 = vmatpush1.bf16.msra.mxu0 %v5963_v56  ;;  %v6034_v56 = vld [vmem:[#allocation5 + $0x94c] ss:$16 sps:$4 sm:$0xff]  }
 0x1a8   :  { %4406 = vmatpush1.bf16.msra.mxu1 %v5966_v57  ;;  %4354 = vmatprep.subr.bf16.mxu0 %v5971_v58  ;;  %v6029_v57 = vld [vmem:[#allocation5 + $0x748] ss:$16 sps:$4 sm:$0xff]   ;;  %v6037_v61 = vld [vmem:[#allocation5 + $0x72c] ss:$16 sps:$4 sm:$0xff]  }
 0x1a9   :  { %4407 = vmatprep.subr.bf16.mxu1 %v5974_v59  ;;  %4380 = vmatprep.mubr.bf16.mxu0 %v6251_v3  ;;  %v6032_v58 = vld [vmem:[#allocation5 + $0x948] ss:$16 sps:$4 sm:$0xff]   ;;  %v6405_v59 = vpop.f32.mrf.mxu1  ;;  %v6411_v3 = vpop.f32.mrf.mxu0 }
 0x1aa   :  { %4433 = vmatprep.mubr.bf16.mxu1 %v6252_v4  ;;  %v6043_v4 = vld [vmem:[#allocation5 + $0x70c] ss:$16 sps:$4 sm:$0xff]  }
 0x1ab   :  { %4355 = vmatpush1.bf16.msra.mxu0 %v5969_v62  ;;  %v6040_v62 = vld [vmem:[#allocation5 + $0x92c] ss:$16 sps:$4 sm:$0xff]  }
 0x1ac   :  { %4408 = vmatpush1.bf16.msra.mxu1 %v5972_v63  ;;  %4356 = vmatprep.subr.bf16.mxu0 %v5977_v1  ;;  %v6035_v63 = vld [vmem:[#allocation5 + $0x728] ss:$16 sps:$4 sm:$0xff]  }
 0x1ad   :  { %4409 = vmatprep.subr.bf16.mxu1 %v5980_v2  ;;  %v6038_v1 = vld [vmem:[#allocation5 + $0x928] ss:$16 sps:$4 sm:$0xff]   ;;  %v6409_v2 = vpop.f32.mrf.mxu1 }
 0x1af   :  { %4357 = vmatpush1.bf16.msra.mxu0 %v5975_v5  ;;  %v6046_v5 = vld [vmem:[#allocation5 + $0x90c] ss:$16 sps:$4 sm:$0xff]  }
 0x1b0   :  { %4410 = vmatpush1.bf16.msra.mxu1 %v5978_v6  ;;  %4358 = vmatprep.subr.bf16.mxu0 %v5983_v8  ;;  %v6413_v6 = vpop.f32.mrf.mxu1  ;;  %v6041_v8 = vld [vmem:[#allocation5 + $0x708] ss:$16 sps:$4 sm:$0xff]  }
 0x1b1   :  { %4411 = vmatprep.subr.bf16.mxu1 %v5986_v9  ;;  %v6044_v9 = vld [vmem:[#allocation5 + $0x908] ss:$16 sps:$4 sm:$0xff]  }
 0x1b3   :  { %4359 = vmatpush1.bf16.msra.mxu0 %v5981_v10  ;;  %v6415_v10 = vpop.f32.mrf.mxu0 }
 0x1b4   :  { %4412 = vmatpush1.bf16.msra.mxu1 %v5984_v11  ;;  %4360 = vmatprep.subr.bf16.mxu0 %v5989_v13  ;;  %v6049_v11 = vld [vmem:[#allocation5 + $0xaec] ss:$16 sps:$4 sm:$0xff]  }
 0x1b5   :  { %4413 = vmatprep.subr.bf16.mxu1 %v5992_v14  ;;  %v6052_v13 = vld [vmem:[#allocation5 + $0xcec] ss:$16 sps:$4 sm:$0xff]   ;;  %v6417_v14 = vpop.f32.mrf.mxu1 }
 0x1b7   :  { %4361 = vmatpush1.bf16.msra.mxu0 %v5987_v15  ;;  %v6047_v15 = vld [vmem:[#allocation5 + $0xae8] ss:$16 sps:$4 sm:$0xff]  }
 0x1b8   :  { %4414 = vmatpush1.bf16.msra.mxu1 %v5990_v16  ;;  %4362 = vmatprep.subr.bf16.mxu0 %v5995_v18  ;;  %v6050_v16 = vld [vmem:[#allocation5 + $0xce8] ss:$16 sps:$4 sm:$0xff]   ;;  %v6419_v18 = vpop.f32.mrf.mxu0 }
 0x1b9   :  { %4415 = vmatprep.subr.bf16.mxu1 %v5998_v19  ;;  %v6055_v19 = vld [vmem:[#allocation5 + $0xacc] ss:$16 sps:$4 sm:$0xff]  }
 0x1bb   :  { %4363 = vmatpush1.bf16.msra.mxu0 %v5993_v21  ;;  %v6058_v21 = vld [vmem:[#allocation5 + $0xccc] ss:$16 sps:$4 sm:$0xff]  }
 0x1bc   :  { %4416 = vmatpush1.bf16.msra.mxu1 %v5996_v22  ;;  %4364 = vmatprep.subr.bf16.mxu0 %v6001_v23  ;;  %v6421_v22 = vpop.f32.mrf.mxu1  ;;  %v6253_v23 = vld [vmem:[#allocation2 + $0x18] ss:$72 sps:$4 sm:$0xff]  }
 0x1bd   :  { %4417 = vmatprep.subr.bf16.mxu1 %v6004_v24  ;;  %v6254_v24 = vld [vmem:[#allocation2 + $0x20] ss:$72 sps:$4 sm:$0xff]  }
 0x1bf   :  { %4365 = vmatpush2.bf16.msra.mxu0 %v5999_v27  ;;  %v6053_v27 = vld [vmem:[#allocation5 + $0xac8] ss:$16 sps:$4 sm:$0xff]  }
 0x1c0   :  { %4418 = vmatpush2.bf16.msra.mxu1 %v6002_v28  ;;  %4366 = vmatprep.subr.bf16.mxu0 %v6007_v29  ;;  %v6056_v28 = vld [vmem:[#allocation5 + $0xcc8] ss:$16 sps:$4 sm:$0xff]   ;;  %v6423_v29 = vpop.f32.mrf.mxu0 }
 0x1c1   :  { %4419 = vmatprep.subr.bf16.mxu1 %v6010_v30  ;;  %v6061_v30 = vld [vmem:[#allocation5 + $0xaac] ss:$16 sps:$4 sm:$0xff]  }
 0x1c3   :  { %4367 = vmatpush2.bf16.msra.mxu0 %v6005_v33  ;;  %v6064_v33 = vld [vmem:[#allocation5 + $0xcac] ss:$16 sps:$4 sm:$0xff]  }
 0x1c4   :  { %4420 = vmatpush2.bf16.msra.mxu1 %v6008_v34  ;;  %4368 = vmatprep.subr.bf16.mxu0 %v6013_v35  ;;  %v6255_v34 = vld [vmem:[#allocation2 + $0xac] ss:$72 sps:$4 sm:$0xff]  }
 0x1c5   :  { %4421 = vmatprep.subr.bf16.mxu1 %v6016_v36  ;;  %v6256_v35 = vld [vmem:[#allocation2 + $0xb4] ss:$72 sps:$4 sm:$0xff]   ;;  %v6425_v36 = vpop.f32.mrf.mxu1 }
 0x1c7   :  { %4369 = vmatpush2.bf16.msra.mxu0 %v6011_v39  ;;  %v6427_v39 = vpop.f32.mrf.mxu0 }
 0x1c8   :  { %4422 = vmatpush2.bf16.msra.mxu1 %v6014_v40  ;;  %4370 = vmatprep.subr.bf16.mxu0 %v6019_v42  ;;  %v6059_v40 = vld [vmem:[#allocation5 + $0xaa8] ss:$16 sps:$4 sm:$0xff]  }
 0x1c9   :  { %4423 = vmatprep.subr.bf16.mxu1 %v6022_v43  ;;  %v6062_v42 = vld [vmem:[#allocation5 + $0xca8] ss:$16 sps:$4 sm:$0xff]   ;;  %v6429_v43 = vpop.f32.mrf.mxu1 }
 0x1cb   :  { %4371 = vmatpush2.bf16.msra.mxu0 %v6017_v45  ;;  %v6067_v45 = vld [vmem:[#allocation5 + $0xa8c] ss:$16 sps:$4 sm:$0xff]  }
 0x1cc   :  { %4424 = vmatpush2.bf16.msra.mxu1 %v6020_v46  ;;  %4372 = vmatprep.subr.bf16.mxu0 %v6025_v49  ;;  %v6070_v46 = vld [vmem:[#allocation5 + $0xc8c] ss:$16 sps:$4 sm:$0xff]   ;;  %v6431_v49 = vpop.f32.mrf.mxu0 }
 0x1cd   :  { %4425 = vmatprep.subr.bf16.mxu1 %v6028_v50  ;;  %v6257_v50 = vld [vmem:[#allocation2 + $0xa8] ss:$72 sps:$4 sm:$0xff]  }
 0x1cf   :  { %4373 = vmatpush2.bf16.msra.mxu0 %v6023_v51  ;;  %v6258_v51 = vld [vmem:[#allocation2 + $0xb0] ss:$72 sps:$4 sm:$0xff]  }
 0x1d0   :  { %4426 = vmatpush2.bf16.msra.mxu1 %v6026_v52  ;;  %4374 = vmatprep.subr.bf16.mxu0 %v6031_v55  ;;  %v6065_v52 = vld [vmem:[#allocation5 + $0xa88] ss:$16 sps:$4 sm:$0xff]  }
 0x1d1   :  { %4427 = vmatprep.subr.bf16.mxu1 %v6034_v56  ;;  %v6068_v55 = vld [vmem:[#allocation5 + $0xc88] ss:$16 sps:$4 sm:$0xff]   ;;  %v6433_v56 = vpop.f32.mrf.mxu1 }
 0x1d3   :  { %4375 = vmatpush2.bf16.msra.mxu0 %v6029_v57  ;;  %v6073_v57 = vld [vmem:[#allocation5 + $0xa6c] ss:$16 sps:$4 sm:$0xff]  }
 0x1d4   :  { %4428 = vmatpush2.bf16.msra.mxu1 %v6032_v58  ;;  %4376 = vmatprep.subr.bf16.mxu0 %v6037_v61  ;;  %v6076_v58 = vld [vmem:[#allocation5 + $0xc6c] ss:$16 sps:$4 sm:$0xff]  }
 0x1d5   :  { %4429 = vmatprep.subr.bf16.mxu1 %v6040_v62  ;;  %v6259_v61 = vld [vmem:[#allocation2 + $0x2c] ss:$72 sps:$4 sm:$0xff]  }
 0x1d6   :  { %v6260_v62 = vld [vmem:[#allocation2 + $0x34] ss:$72 sps:$4 sm:$0xff]  }
 0x1d7   :  { %4377 = vmatpush2.bf16.msra.mxu0 %v6035_v63  ;;  %v6435_v63 = vpop.f32.mrf.mxu0 }
 0x1d8   :  { %4430 = vmatpush2.bf16.msra.mxu1 %v6038_v1  ;;  %4378 = vmatprep.subr.bf16.mxu0 %v6043_v4  ;;  %v6071_v1 = vld [vmem:[#allocation5 + $0xa68] ss:$16 sps:$4 sm:$0xff]  }
 0x1d9   :  { %4431 = vmatprep.subr.bf16.mxu1 %v6046_v5  ;;  %v6074_v4 = vld [vmem:[#allocation5 + $0xc68] ss:$16 sps:$4 sm:$0xff]   ;;  %v6437_v5 = vpop.f32.mrf.mxu1 }
 0x1db   :  { %4379 = vmatpush2.bf16.msra.mxu0 %v6041_v8  ;;  %v6079_v8 = vld [vmem:[#allocation5 + $0xa4c] ss:$16 sps:$4 sm:$0xff]  }
 0x1dc   :  { %4432 = vmatpush2.bf16.msra.mxu1 %v6044_v9  ;;  %4454 = vmatprep.subr.bf16.mxu0 %v6049_v11  ;;  %v6082_v9 = vld [vmem:[#allocation5 + $0xc4c] ss:$16 sps:$4 sm:$0xff]   ;;  %v6439_v11 = vpop.f32.mrf.mxu0 }
 0x1dd   :  { %4507 = vmatprep.subr.bf16.mxu1 %v6052_v13  ;;  %v6077_v13 = vld [vmem:[#allocation5 + $0xa48] ss:$16 sps:$4 sm:$0xff]  }
 0x1de   :  { %4381 = vmatmul.mubr.bf16.vlgmr.msra.gmra.mxu0 %v6253_v23 }
 0x1df   :  { %4434 = vmatmul.mubr.bf16.vlgmr.msra.gmra.mxu1 %v6254_v24  ;;  %4455 = vmatpush1.bf16.msra.mxu0 %v6047_v15  ;;  %v6080_v15 = vld [vmem:[#allocation5 + $0xc48] ss:$16 sps:$4 sm:$0xff]   ;;  %v6445_v24 = vpop.f32.mrf.mxu0 }
 0x1e0   :  { %4508 = vmatpush1.bf16.msra.mxu1 %v6050_v16  ;;  %4456 = vmatprep.subr.bf16.mxu0 %v6055_v19  ;;  %v6441_v16 = vpop.f32.mrf.mxu1  ;;  %v6085_v19 = vld [vmem:[#allocation5 + $0xa2c] ss:$16 sps:$4 sm:$0xff]  }
 0x1e1   :  { %4509 = vmatprep.subr.bf16.mxu1 %v6058_v21  ;;  %4390 = vmatprep.mubr.bf16.mxu0 %v6255_v34  ;;  %v6088_v21 = vld [vmem:[#allocation5 + $0xc2c] ss:$16 sps:$4 sm:$0xff]  }
 0x1e2   :  { %4443 = vmatprep.mubr.bf16.mxu1 %v6256_v35  ;;  %v6443_v23 = vpop.f32.mrf.mxu1  ;;  %v6449_v35 = vpop.f32.mrf.mxu0 }
 0x1e3   :  { %4457 = vmatpush1.bf16.msra.mxu0 %v6053_v27  ;;  %v6083_v27 = vld [vmem:[#allocation5 + $0xa28] ss:$16 sps:$4 sm:$0xff]  }
 0x1e4   :  { %4510 = vmatpush1.bf16.msra.mxu1 %v6056_v28  ;;  %4458 = vmatprep.subr.bf16.mxu0 %v6061_v30  ;;  %v6086_v28 = vld [vmem:[#allocation5 + $0xc28] ss:$16 sps:$4 sm:$0xff]   ;;  %v6091_v30 = vld [vmem:[#allocation5 + $0xa0c] ss:$16 sps:$4 sm:$0xff]   ;;  %v6447_v34 = vpop.f32.mrf.mxu1 }
 0x1e5   :  { %4511 = vmatprep.subr.bf16.mxu1 %v6064_v33  ;;  %v6094_v33 = vld [vmem:[#allocation5 + $0xc0c] ss:$16 sps:$4 sm:$0xff]  }
 0x1e6   :  { %4391 = vmatmul.mubr.bf16.gmra.mxu0 %v6257_v50  ;;  %v6451_v50 = vpop.f32.mrf.mxu1 }
 0x1e7   :  { %4444 = vmatmul.mubr.bf16.gmra.mxu1 %v6258_v51  ;;  %4459 = vmatpush1.bf16.msra.mxu0 %v6059_v40  ;;  %v6089_v40 = vld [vmem:[#allocation5 + $0xa08] ss:$16 sps:$4 sm:$0xff]   ;;  %v6453_v51 = vpop.f32.mrf.mxu0 }
 0x1e8   :  { %4512 = vmatpush1.bf16.msra.mxu1 %v6062_v42  ;;  %4460 = vmatprep.subr.bf16.mxu0 %v6067_v45  ;;  %v6092_v42 = vld [vmem:[#allocation5 + $0xc08] ss:$16 sps:$4 sm:$0xff]   ;;  %v6097_v45 = vld [vmem:[#allocation5 + $0xbec] ss:$16 sps:$4 sm:$0xff]  }
 0x1e9   :  { %4513 = vmatprep.subr.bf16.mxu1 %v6070_v46  ;;  %4486 = vmatprep.mubr.bf16.mxu0 %v6259_v61  ;;  %v6100_v46 = vld [vmem:[#allocation5 + $0xdec] ss:$16 sps:$4 sm:$0xff]   ;;  %v6455_v61 = vpop.f32.mrf.mxu1 }
 0x1ea   :  { %4539 = vmatprep.mubr.bf16.mxu1 %v6260_v62  ;;  %v6457_v62 = vpop.f32.mrf.mxu0 }
 0x1eb   :  { %4461 = vmatpush1.bf16.msra.mxu0 %v6065_v52  ;;  %v6095_v52 = vld [vmem:[#allocation5 + $0xbe8] ss:$16 sps:$4 sm:$0xff]  }
 0x1ec   :  { %4514 = vmatpush1.bf16.msra.mxu1 %v6068_v55  ;;  %4462 = vmatprep.subr.bf16.mxu0 %v6073_v57  ;;  %v6098_v55 = vld [vmem:[#allocation5 + $0xde8] ss:$16 sps:$4 sm:$0xff]   ;;  %v6103_v57 = vld [vmem:[#allocation5 + $0xbcc] ss:$16 sps:$4 sm:$0xff]  }
 0x1ed   :  { %4515 = vmatprep.subr.bf16.mxu1 %v6076_v58  ;;  %v6106_v58 = vld [vmem:[#allocation5 + $0xdcc] ss:$16 sps:$4 sm:$0xff]  }
 0x1ef   :  { %4463 = vmatpush1.bf16.msra.mxu0 %v6071_v1  ;;  %v6101_v1 = vld [vmem:[#allocation5 + $0xbc8] ss:$16 sps:$4 sm:$0xff]  }
 0x1f0   :  { %4516 = vmatpush1.bf16.msra.mxu1 %v6074_v4  ;;  %4464 = vmatprep.subr.bf16.mxu0 %v6079_v8  ;;  %v6104_v4 = vld [vmem:[#allocation5 + $0xdc8] ss:$16 sps:$4 sm:$0xff]   ;;  %v6459_v8 = vpop.f32.mrf.mxu1 }
 0x1f1   :  { %4517 = vmatprep.subr.bf16.mxu1 %v6082_v9  ;;  %v6461_v9 = vpop.f32.mrf.mxu0 }
 0x1f3   :  { %4465 = vmatpush1.bf16.msra.mxu0 %v6077_v13  ;;  %v6109_v13 = vld [vmem:[#allocation5 + $0xbac] ss:$16 sps:$4 sm:$0xff]  }
 0x1f4   :  { %4518 = vmatpush1.bf16.msra.mxu1 %v6080_v15  ;;  %4466 = vmatprep.subr.bf16.mxu0 %v6085_v19  ;;  %v6112_v15 = vld [vmem:[#allocation5 + $0xdac] ss:$16 sps:$4 sm:$0xff]   ;;  %v6107_v19 = vld [vmem:[#allocation5 + $0xba8] ss:$16 sps:$4 sm:$0xff]  }
 0x1f5   :  { %4519 = vmatprep.subr.bf16.mxu1 %v6088_v21  ;;  %v6110_v21 = vld [vmem:[#allocation5 + $0xda8] ss:$16 sps:$4 sm:$0xff]  }
 0x1f7   :  { %4467 = vmatpush1.bf16.msra.mxu0 %v6083_v27  ;;  %v6463_v27 = vpop.f32.mrf.mxu1 }
 0x1f8   :  { %4520 = vmatpush1.bf16.msra.mxu1 %v6086_v28  ;;  %4468 = vmatprep.subr.bf16.mxu0 %v6091_v30  ;;  %v6465_v28 = vpop.f32.mrf.mxu0  ;;  %v6115_v30 = vld [vmem:[#allocation5 + $0xb8c] ss:$16 sps:$4 sm:$0xff]  }
 0x1f9   :  { %4521 = vmatprep.subr.bf16.mxu1 %v6094_v33  ;;  %v6118_v33 = vld [vmem:[#allocation5 + $0xd8c] ss:$16 sps:$4 sm:$0xff]  }
 0x1fb   :  { %4469 = vmatpush1.bf16.msra.mxu0 %v6089_v40  ;;  %v6113_v40 = vld [vmem:[#allocation5 + $0xb88] ss:$16 sps:$4 sm:$0xff]  }
 0x1fc   :  { %4522 = vmatpush1.bf16.msra.mxu1 %v6092_v42  ;;  %4470 = vmatprep.subr.bf16.mxu0 %v6097_v45  ;;  %v6116_v42 = vld [vmem:[#allocation5 + $0xd88] ss:$16 sps:$4 sm:$0xff]   ;;  %v6467_v45 = vpop.f32.mrf.mxu1 }
 0x1fd   :  { %4523 = vmatprep.subr.bf16.mxu1 %v6100_v46  ;;  %v6469_v46 = vpop.f32.mrf.mxu0 }
 0x1ff   :  { %4471 = vmatpush2.bf16.msra.mxu0 %v6095_v52  ;;  %v6121_v52 = vld [vmem:[#allocation5 + $0xb6c] ss:$16 sps:$4 sm:$0xff]  }
 0x200   :  { %4524 = vmatpush2.bf16.msra.mxu1 %v6098_v55  ;;  %4472 = vmatprep.subr.bf16.mxu0 %v6103_v57  ;;  %v6124_v55 = vld [vmem:[#allocation5 + $0xd6c] ss:$16 sps:$4 sm:$0xff]   ;;  %v3800_v57 = vadd.f32 %v6381_v25, %v6371_v0  ;;  %v3804_v0 = vadd.f32 %v6389_v37, %v6375_v12  ;;  %v3810_v12 = vadd.f32 %v6397_v47, %v6379_v20 }
 0x201   :  { %4525 = vmatprep.subr.bf16.mxu1 %v6106_v58  ;;  %v6119_v58 = vld [vmem:[#allocation5 + $0xb68] ss:$16 sps:$4 sm:$0xff]   ;;  %v6139_v20 = vld [vmem:[#allocation5 + $0xb0c] ss:$16 sps:$4 sm:$0xff]  }
 0x202   :  { %v6142_v47 = vld [vmem:[#allocation5 + $0xd0c] ss:$16 sps:$4 sm:$0xff]  }
 0x203   :  { %4473 = vmatpush2.bf16.msra.mxu0 %v6101_v1  ;;  %v6122_v1 = vld [vmem:[#allocation5 + $0xd68] ss:$16 sps:$4 sm:$0xff]  }
 0x204   :  { %4526 = vmatpush2.bf16.msra.mxu1 %v6104_v4  ;;  %4474 = vmatprep.subr.bf16.mxu0 %v6109_v13  ;;  %v6473_v4 = vpop.f32.mrf.mxu1  ;;  %v6475_v13 = vpop.f32.mrf.mxu0 }
 0x205   :  { %4527 = vmatprep.subr.bf16.mxu1 %v6112_v15  ;;  %6563 = vst [vmem:[#allocation11_spill] sm:$0xff] %v6473_v4  ;;  %v6127_v15 = vld [vmem:[#allocation5 + $0xb4c] ss:$16 sps:$4 sm:$0xff]  }
 0x206   :  { %v6136_v4 = vld [vmem:[#allocation5 + $0xd2c] ss:$16 sps:$4 sm:$0xff]  }
 0x207   :  { %4475 = vmatpush2.bf16.msra.mxu0 %v6107_v19  ;;  %v6130_v19 = vld [vmem:[#allocation5 + $0xd4c] ss:$16 sps:$4 sm:$0xff]  }
 0x208   :  { %4528 = vmatpush2.bf16.msra.mxu1 %v6110_v21  ;;  %4476 = vmatprep.subr.bf16.mxu0 %v6115_v30  ;;  %v3802_v21 = vadd.f32 %v6385_v31, %v6373_v7  ;;  %v3853_v30 = vadd.f32 %v6393_v41, %v3800_v57  ;;  %v3806_v7 = vadd.f32 %v6395_v44, %v6377_v17 }
 0x209   :  { %4529 = vmatprep.subr.bf16.mxu1 %v6118_v33  ;;  %v6480_v33 = vpop.f32.mrf.mxu1  ;;  %v3857_v41 = vadd.f32 %v6403_v54, %v3804_v0  ;;  %v3812_v17 = vadd.f32 %v6401_v53, %v6383_v26  ;;  %v3863_v44 = vadd.f32 %v6411_v3, %v3810_v12  ;;  %v6262_v12 = vld [vmem:[#allocation2 + $0x30] ss:$72 sps:$4 sm:$0xff]  }
 0x20a   :  { %v3855_v25 = vadd.f32 %v6399_v48, %v3802_v21  ;;  %v3906_v31 = vadd.f32 %v6413_v6, %v3853_v30  ;;  %v3859_v57 = vadd.f32 %v6407_v60, %v3806_v7  ;;  %v6140_v21 = vld [vmem:[#allocation5 + $0xd08] ss:$16 sps:$4 sm:$0xff]  }
 0x20b   :  { %4477 = vmatpush2.bf16.msra.mxu0 %v6113_v40  ;;  %v6125_v40 = vld [vmem:[#allocation5 + $0xb48] ss:$16 sps:$4 sm:$0xff]   ;;  %v6493_v37 = vpop.f32.mrf.mxu1  ;;  %v3910_v6 = vadd.f32 %v6421_v22, %v3857_v41  ;;  %v3816_v22 = vadd.f32 %v6409_v2, %v6391_v38 }
 0x20c   :  { %4530 = vmatpush2.bf16.msra.mxu1 %v6116_v42  ;;  %4478 = vmatprep.subr.bf16.mxu0 %v6121_v52  ;;  %v6128_v42 = vld [vmem:[#allocation5 + $0xd48] ss:$16 sps:$4 sm:$0xff]   ;;  %v6485_v52 = vpop.f32.mrf.mxu0  ;;  %v3908_v48 = vadd.f32 %v6417_v14, %v3855_v25  ;;  %v3814_v14 = vadd.f32 %v6405_v59, %v6387_v32  ;;  %v3912_v26 = vadd.f32 %v6425_v36, %v3859_v57  ;;  %v6148_v36 = vld [vmem:[#allocation5 + $0x10ec] ss:$16 sps:$4 sm:$0xff]  }
 0x20d   :  { %4531 = vmatprep.subr.bf16.mxu1 %v6124_v55  ;;  %v6133_v55 = vld [vmem:[#allocation5 + $0xb2c] ss:$16 sps:$4 sm:$0xff]   ;;  %v3963_v3 = vadd.f32 %v6435_v63, %v3910_v6  ;;  %v3869_v38 = vadd.f32 %v6423_v29, %v3816_v22  ;;  %v6261_v41 = vld [vmem:[#allocation2 + $0x28] ss:$72 sps:$4 sm:$0xff]  }
 0x20e   :  { %v6501_v54 = vpop.f32.mrf.mxu0  ;;  %v3961_v60 = vadd.f32 %v6431_v49, %v3908_v48  ;;  %v3916_v49 = vadd.f32 %v6429_v43, %v3863_v44  ;;  %v3867_v32 = vadd.f32 %v6419_v18, %v3814_v14  ;;  %v3965_v63 = vadd.f32 %v6439_v11, %v3912_v26  ;;  %v6151_v29 = vld [vmem:[#allocation5 + $0xecc] ss:$16 sps:$4 sm:$0xff]   ;;  %v6155_v14 = vld [vmem:[#allocation5 + $0xea8] ss:$16 sps:$4 sm:$0xff]  }
 0x20f   :  { %4479 = vmatpush2.bf16.msra.mxu0 %v6119_v58  ;;  %v3959_v58 = vadd.f32 %v6427_v39, %v3906_v31  ;;  %v3865_v39 = vadd.f32 %v6415_v10, %v3812_v17  ;;  %v6145_v10 = vld [vmem:[#allocation5 + $0xeec] ss:$16 sps:$4 sm:$0xff]   ;;  %v4016_v18 = vadd.f32 %v6451_v50, %v3963_v3  ;;  %v3922_v7 = vadd.f32 %v6441_v16, %v3869_v38  ;;  %v6564_v3 = vld [vmem:[#allocation11_spill] sm:$0xff] }
 0x210   :  { %4532 = vmatpush2.bf16.msra.mxu1 %v6122_v1  ;;  %4480 = vmatprep.subr.bf16.mxu0 %v6127_v15  ;;  %v6131_v1 = vld [vmem:[#allocation5 + $0xb28] ss:$16 sps:$4 sm:$0xff]   ;;  %v6517_v59 = vpop.f32.mrf.mxu0  ;;  %v3969_v2 = vadd.f32 %v6445_v24, %v3916_v49  ;;  %v4018_v24 = vadd.f32 %v6455_v61, %v3965_v63  ;;  %v6263_v44 = vld [vmem:[#allocation2 + $0xbc] ss:$72 sps:$4 sm:$0xff]  }
 0x211   :  { %4533 = vmatprep.subr.bf16.mxu1 %v6130_v19  ;;  %v6134_v15 = vld [vmem:[#allocation5 + $0xd28] ss:$16 sps:$4 sm:$0xff]   ;;  %v6508_v19 = vpop.f32.mrf.mxu1  ;;  %v4012_v53 = vadd.f32 %v6443_v23, %v3959_v58  ;;  %v4014_v23 = vadd.f32 %v6447_v34, %v3961_v60  ;;  %v3918_v0 = vadd.f32 %v6433_v56, %v3865_v39  ;;  %v3920_v34 = vadd.f32 %v6437_v5, %v3867_v32  ;;  %v6154_v56 = vld [vmem:[#allocation5 + $0x10cc] ss:$16 sps:$4 sm:$0xff]  }
 0x212   :  { %v4022_v31 = vadd.f32 %v6459_v8, %v3969_v2  ;;  %v4071_v57 = vadd.f32 %v6475_v13, %v4018_v24  ;;  %v3975_v8 = vadd.f32 %v6457_v62, %v3922_v7  ;;  %v6158_v39 = vld [vmem:[#allocation5 + $0x10a8] ss:$16 sps:$4 sm:$0xff]   ;;  %v6163_v26 = vld [vmem:[#allocation5 + $0xe8c] ss:$16 sps:$4 sm:$0xff]  }
 0x213   :  { %4481 = vmatpush2.bf16.msra.mxu0 %v6125_v40  ;;  %v4065_v30 = vadd.f32 %v6461_v9, %v4012_v53  ;;  %v4123_v43 = vpop.f32.mrf.mxu1  ;;  %v4067_v25 = vadd.f32 %v6465_v28, %v4014_v23  ;;  %v6143_v40 = vld [vmem:[#allocation5 + $0xee8] ss:$16 sps:$4 sm:$0xff]   ;;  %v3971_v11 = vadd.f32 %v6449_v35, %v3918_v0  ;;  %v4069_v28 = vadd.f32 %v6469_v46, %v4016_v18  ;;  %v6166_v53 = vld [vmem:[#allocation5 + $0x108c] ss:$16 sps:$4 sm:$0xff]  }
 0x214   :  { %4534 = vmatpush2.bf16.msra.mxu1 %v6128_v42  ;;  %4482 = vmatprep.subr.bf16.mxu0 %v6133_v55  ;;  %v6146_v42 = vld [vmem:[#allocation5 + $0x10e8] ss:$16 sps:$4 sm:$0xff]   ;;  %v6529_v55 = vpop.f32.mrf.mxu0  ;;  %v3973_v5 = vadd.f32 %v6453_v51, %v3920_v34  ;;  %v4124_v62 = vadd.f32 %v4123_v43, %v4071_v57  ;;  %v6172_v2 = vld [vmem:[#allocation5 + $0x106c] ss:$16 sps:$4 sm:$0xff]  }
 0x215   :  { %4535 = vmatprep.subr.bf16.mxu1 %v6136_v4  ;;  %v6137_v4 = vld [vmem:[#allocation5 + $0xb08] ss:$16 sps:$4 sm:$0xff]   ;;  %v4127_v9 = vpop.f32.mrf.mxu1  ;;  %v4118_v50 = vadd.f32 %v6480_v33, %v4065_v30  ;;  %v4120_v48 = vadd.f32 %v6493_v37, %v4067_v25  ;;  %v4024_v16 = vadd.f32 %v6463_v27, %v3971_v11  ;;  %v4122_v17 = vadd.f32 %v6508_v19, %v4069_v28  ;;  %v6267_v25 = vld [vmem:[#allocation2 + $0x3c] ss:$72 sps:$4 sm:$0xff]  }
 0x216   :  { %v6149_v33 = vld [vmem:[#allocation5 + $0xec8] ss:$16 sps:$4 sm:$0xff]   ;;  %v4075_v37 = vadd.f32 %v6485_v52, %v4022_v31  ;;  %v4026_v27 = vadd.f32 %v6467_v45, %v3973_v5  ;;  %v6178_v24 = vld [vmem:[#allocation5 + $0x104c] ss:$16 sps:$4 sm:$0xff]  }
 0x217   :  { %4483 = vmatpush2.bf16.msra.mxu0 %v6131_v1  ;;  %v6152_v46 = vld [vmem:[#allocation5 + $0x10c8] ss:$16 sps:$4 sm:$0xff]   ;;  %v4129_v58 = vpop.f32.mrf.mxu1  ;;  %v6157_v1 = vld [vmem:[#allocation5 + $0xeac] ss:$16 sps:$4 sm:$0xff]   ;;  %v4077_v6 = vadd.f32 %v6501_v54, %v4024_v16 }
 0x218   :  { %4536 = vmatpush2.bf16.msra.mxu1 %v6134_v15  ;;  %4484 = vmatprep.subr.bf16.mxu0 %v6139_v20  ;;  %v6160_v15 = vld [vmem:[#allocation5 + $0x10ac] ss:$16 sps:$4 sm:$0xff]   ;;  %v4079_v45 = vadd.f32 %v6517_v59, %v4026_v27  ;;  %v6265_v49 = vld [vmem:[#allocation2 + $0xb8] ss:$72 sps:$4 sm:$0xff]  }
 0x219   :  { %4537 = vmatprep.subr.bf16.mxu1 %v6142_v47  ;;  %v6264_v20 = vld [vmem:[#allocation2 + $0xc4] ss:$72 sps:$4 sm:$0xff]   ;;  %v4131_v19 = vpop.f32.mrf.mxu1  ;;  %v6266_v32 = vld [vmem:[#allocation2 + $0xc0] ss:$72 sps:$4 sm:$0xff]  }
 0x21a   :  { %v6161_v63 = vld [vmem:[#allocation5 + $0xe88] ss:$16 sps:$4 sm:$0xff]   ;;  %v6169_v59 = vld [vmem:[#allocation5 + $0xe6c] ss:$16 sps:$4 sm:$0xff]   ;;  %v4132_v43 = vadd.f32 %v4131_v19, %v4079_v45 }
 0x21b   :  { %4485 = vmatpush2.bf16.msra.mxu0 %v6137_v4  ;;  %v4028_v4 = vadd.f32 %v6564_v3, %v3975_v8  ;;  %v6164_v30 = vld [vmem:[#allocation5 + $0x1088] ss:$16 sps:$4 sm:$0xff]   ;;  %v4133_v0 = vpop.f32.mrf.mxu1  ;;  %v6181_v31 = vld [vmem:[#allocation5 + $0xe2c] ss:$16 sps:$4 sm:$0xff]  }
 0x21c   :  { %4538 = vmatpush2.bf16.msra.mxu1 %v6140_v21  ;;  %4560 = vmatprep.subr.bf16.mxu0 %v6145_v10  ;;  %v4128_v21 = vadd.f32 %v4127_v9, %v4075_v37  ;;  %v4130_v10 = vadd.f32 %v4129_v58, %v4077_v6  ;;  %v6167_v9 = vld [vmem:[#allocation5 + $0xe68] ss:$16 sps:$4 sm:$0xff]   ;;  %v6184_v5 = vld [vmem:[#allocation5 + $0x102c] ss:$16 sps:$4 sm:$0xff]  }
 0x21d   :  { %4613 = vmatprep.subr.bf16.mxu1 %v6148_v36  ;;  %v4081_v36 = vadd.f32 %v6529_v55, %v4028_v4  ;;  %v6170_v55 = vld [vmem:[#allocation5 + $0x1068] ss:$16 sps:$4 sm:$0xff]   ;;  %v6199_v58 = vld [vmem:[#allocation5 + $0xfcc] ss:$16 sps:$4 sm:$0xff]  }
 0x21e   :  { %v4170_v35 = vpop.f32.mrf.mxu0  ;;  %4487 = vmatmul.mubr.bf16.vlgmr.msra.gmra.mxu0 %v6261_v41  ;;  %v6173_v28 = vld [vmem:[#allocation5 + $0xe48] ss:$16 sps:$4 sm:$0xff]   ;;  %v6208_v37 = vld [vmem:[#allocation5 + $0x11ac] ss:$16 sps:$4 sm:$0xff]  }
 0x21f   :  { %4540 = vmatmul.mubr.bf16.vlgmr.msra.gmra.mxu1 %v6262_v12  ;;  %v4171_v61 = vadd.f32 %v4170_v35, %v4118_v50  ;;  %4561 = vmatpush1.bf16.msra.mxu0 %v6143_v40  ;;  %v6268_v40 = vld [vmem:[#allocation2 + $0x44] ss:$72 sps:$4 sm:$0xff]   ;;  %v4134_v34 = vadd.f32 %v4133_v0, %v4081_v36  ;;  %v6176_v7 = vld [vmem:[#allocation5 + $0x1048] ss:$16 sps:$4 sm:$0xff]  }
 0x220   :  { %4614 = vmatpush1.bf16.msra.mxu1 %v6146_v42  ;;  %v4172_v51 = vpop.f32.mrf.mxu0  ;;  %4562 = vmatprep.subr.bf16.mxu0 %v6151_v29  ;;  %v6179_v35 = vld [vmem:[#allocation5 + $0xe28] ss:$16 sps:$4 sm:$0xff]   ;;  %v6187_v12 = vld [vmem:[#allocation5 + $0xe0c] ss:$16 sps:$4 sm:$0xff]  }
 0x221   :  { %4615 = vmatprep.subr.bf16.mxu1 %v6154_v56  ;;  %4666 = vst [vmem:[#allocation7] sm:$0xff] %v4171_v61  ;;  %v4173_v13 = vadd.f32 %v4172_v51, %v4120_v48  ;;  %4496 = vmatprep.mubr.bf16.mxu0 %v6263_v44  ;;  %v6175_v56 = vld [vmem:[#allocation5 + $0xe4c] ss:$16 sps:$4 sm:$0xff]   ;;  %v6182_v41 = vld [vmem:[#allocation5 + $0x1028] ss:$16 sps:$4 sm:$0xff]  }
 0x222   :  { %4549 = vmatprep.mubr.bf16.mxu1 %v6264_v20  ;;  %v4174_v47 = vpop.f32.mrf.mxu0  ;;  %v6190_v48 = vld [vmem:[#allocation5 + $0x100c] ss:$16 sps:$4 sm:$0xff]   ;;  %v6185_v57 = vld [vmem:[#allocation5 + $0xe08] ss:$16 sps:$4 sm:$0xff]  }
 0x223   :  { %4667 = vst [vmem:[#allocation7 + $0x8] sm:$0xff] %v4173_v13  ;;  %v4175_v60 = vadd.f32 %v4174_v47, %v4122_v17  ;;  %4563 = vmatpush1.bf16.msra.mxu0 %v6149_v33  ;;  %v6188_v61 = vld [vmem:[#allocation5 + $0x1008] ss:$16 sps:$4 sm:$0xff]   ;;  %v6193_v33 = vld [vmem:[#allocation5 + $0xfec] ss:$16 sps:$4 sm:$0xff]  }
 0x224   :  { %4616 = vmatpush1.bf16.msra.mxu1 %v6152_v46  ;;  %v4176_v52 = vpop.f32.mrf.mxu0  ;;  %4564 = vmatprep.subr.bf16.mxu0 %v6157_v1  ;;  %v6196_v46 = vld [vmem:[#allocation5 + $0x11ec] ss:$16 sps:$4 sm:$0xff]   ;;  %v6191_v16 = vld [vmem:[#allocation5 + $0xfe8] ss:$16 sps:$4 sm:$0xff]  }
 0x225   :  { %4617 = vmatprep.subr.bf16.mxu1 %v6160_v15  ;;  %4670 = vst [vmem:[#allocation7 + $0x20] sm:$0xff] %v4175_v60  ;;  %v4177_v22 = vadd.f32 %v4176_v52, %v4124_v62  ;;  %v6194_v8 = vld [vmem:[#allocation5 + $0x11e8] ss:$16 sps:$4 sm:$0xff]   ;;  %v6202_v51 = vld [vmem:[#allocation5 + $0x11cc] ss:$16 sps:$4 sm:$0xff]  }
 0x226   :  { %v4180_v54 = vpop.f32.mrf.mxu0  ;;  %4497 = vmatmul.mubr.bf16.gmra.mxu0 %v6265_v49  ;;  %v6197_v1 = vld [vmem:[#allocation5 + $0xfc8] ss:$16 sps:$4 sm:$0xff]   ;;  %v6205_v17 = vld [vmem:[#allocation5 + $0xfac] ss:$16 sps:$4 sm:$0xff]  }
 0x227   :  { %4550 = vmatmul.mubr.bf16.gmra.mxu1 %v6266_v32  ;;  %4671 = vst [vmem:[#allocation7 + $0x28] sm:$0xff] %v4177_v22  ;;  %v4181_v23 = vadd.f32 %v4180_v54, %v4128_v21  ;;  %4565 = vmatpush1.bf16.msra.mxu0 %v6155_v14  ;;  %v6200_v15 = vld [vmem:[#allocation5 + $0x11c8] ss:$16 sps:$4 sm:$0xff]   ;;  %v6211_v20 = vld [vmem:[#allocation5 + $0xf8c] ss:$16 sps:$4 sm:$0xff]  }
 0x228   :  { %4618 = vmatpush1.bf16.msra.mxu1 %v6158_v39  ;;  %v4182_v38 = vpop.f32.mrf.mxu0  ;;  %4566 = vmatprep.subr.bf16.mxu0 %v6163_v26  ;;  %v6203_v13 = vld [vmem:[#allocation5 + $0xfa8] ss:$16 sps:$4 sm:$0xff]   ;;  %v6214_v27 = vld [vmem:[#allocation5 + $0x118c] ss:$16 sps:$4 sm:$0xff]  }
 0x229   :  { %4619 = vmatprep.subr.bf16.mxu1 %v6166_v53  ;;  %4674 = vst [vmem:[#allocation7 + $0x40] sm:$0xff] %v4181_v23  ;;  %v4183_v18 = vadd.f32 %v4182_v38, %v4130_v10  ;;  %4592 = vmatprep.mubr.bf16.mxu0 %v6267_v25  ;;  %v6206_v44 = vld [vmem:[#allocation5 + $0x11a8] ss:$16 sps:$4 sm:$0xff]   ;;  %v6217_v6 = vld [vmem:[#allocation5 + $0xf6c] ss:$16 sps:$4 sm:$0xff]   ;;  %v4223_v38 = vpop.f32.mrf.mxu1 }
 0x22a   :  { %4645 = vmatprep.mubr.bf16.mxu1 %v6268_v40  ;;  %v4184_v42 = vpop.f32.mrf.mxu0  ;;  %v6209_v47 = vld [vmem:[#allocation5 + $0xf88] ss:$16 sps:$4 sm:$0xff]   ;;  %v6220_v60 = vld [vmem:[#allocation5 + $0x116c] ss:$16 sps:$4 sm:$0xff]  }
 0x22b   :  { %4675 = vst [vmem:[#allocation7 + $0x48] sm:$0xff] %v4183_v18  ;;  %v4185_v11 = vadd.f32 %v4184_v42, %v4132_v43  ;;  %4567 = vmatpush1.bf16.msra.mxu0 %v6161_v63  ;;  %v6212_v62 = vld [vmem:[#allocation5 + $0x1188] ss:$16 sps:$4 sm:$0xff]   ;;  %v6223_v19 = vld [vmem:[#allocation5 + $0xf4c] ss:$16 sps:$4 sm:$0xff]  }
 0x22c   :  { %4620 = vmatpush1.bf16.msra.mxu1 %v6164_v30  ;;  %v4186_v29 = vpop.f32.mrf.mxu0  ;;  %4568 = vmatprep.subr.bf16.mxu0 %v6169_v59  ;;  %v6215_v14 = vld [vmem:[#allocation5 + $0xf68] ss:$16 sps:$4 sm:$0xff]   ;;  %v6226_v52 = vld [vmem:[#allocation5 + $0x114c] ss:$16 sps:$4 sm:$0xff]   ;;  %v4225_v59 = vpop.f32.mrf.mxu1 }
 0x22d   :  { %4621 = vmatprep.subr.bf16.mxu1 %v6172_v2  ;;  %4678 = vst [vmem:[#allocation7 + $0x60] sm:$0xff] %v4185_v11  ;;  %v4187_v50 = vadd.f32 %v4186_v29, %v4134_v34  ;;  %v6218_v39 = vld [vmem:[#allocation5 + $0x1168] ss:$16 sps:$4 sm:$0xff]   ;;  %v6229_v3 = vld [vmem:[#allocation5 + $0xf2c] ss:$16 sps:$4 sm:$0xff]  }
 0x22e   :  { %v6221_v26 = vld [vmem:[#allocation5 + $0xf48] ss:$16 sps:$4 sm:$0xff]   ;;  %v6232_v4 = vld [vmem:[#allocation5 + $0x112c] ss:$16 sps:$4 sm:$0xff]   ;;  %v4227_v2 = vpop.f32.mrf.mxu1 }
 0x22f   :  { %4679 = vst [vmem:[#allocation7 + $0x68] sm:$0xff] %v4187_v50  ;;  %4569 = vmatpush1.bf16.msra.mxu0 %v6167_v9  ;;  %v6224_v53 = vld [vmem:[#allocation5 + $0x1148] ss:$16 sps:$4 sm:$0xff]   ;;  %v6235_v22 = vld [vmem:[#allocation5 + $0xf0c] ss:$16 sps:$4 sm:$0xff]  }
 0x230   :  { %4622 = vmatpush1.bf16.msra.mxu1 %v6170_v55  ;;  %4570 = vmatprep.subr.bf16.mxu0 %v6175_v56  ;;  %v6227_v21 = vld [vmem:[#allocation5 + $0xf28] ss:$16 sps:$4 sm:$0xff]   ;;  %v6238_v54 = vld [vmem:[#allocation5 + $0x110c] ss:$16 sps:$4 sm:$0xff]   ;;  %v4229_v43 = vpop.f32.mrf.mxu1 }
 0x231   :  { %4623 = vmatprep.subr.bf16.mxu1 %v6178_v24  ;;  %v6230_v45 = vld [vmem:[#allocation5 + $0x1128] ss:$16 sps:$4 sm:$0xff]   ;;  %v6271_v23 = vld [vmem:[#allocation2 + $0xcc] ss:$72 sps:$4 sm:$0xff]  }
 0x232   :  { %v6233_v49 = vld [vmem:[#allocation5 + $0xf08] ss:$16 sps:$4 sm:$0xff]   ;;  %v6272_v63 = vld [vmem:[#allocation2 + $0xd4] ss:$72 sps:$4 sm:$0xff]   ;;  %v4233_v18 = vpop.f32.mrf.mxu1 }
 0x233   :  { %4571 = vmatpush1.bf16.msra.mxu0 %v6173_v28  ;;  %v6236_v32 = vld [vmem:[#allocation5 + $0x1108] ss:$16 sps:$4 sm:$0xff]  }
 0x234   :  { %4624 = vmatpush1.bf16.msra.mxu1 %v6176_v7  ;;  %4572 = vmatprep.subr.bf16.mxu0 %v6181_v31  ;;  %v6269_v10 = vld [vmem:[#allocation2 + $0x38] ss:$72 sps:$4 sm:$0xff]   ;;  %v6273_v30 = vld [vmem:[#allocation2 + $0xc8] ss:$72 sps:$4 sm:$0xff]   ;;  %v4235_v25 = vpop.f32.mrf.mxu1 }
 0x235   :  { %4625 = vmatprep.subr.bf16.mxu1 %v6184_v5  ;;  %v6270_v36 = vld [vmem:[#allocation2 + $0x40] ss:$72 sps:$4 sm:$0xff]   ;;  %v6274_v0 = vld [vmem:[#allocation2 + $0xd0] ss:$72 sps:$4 sm:$0xff]  }
 0x236   :  { %v4237_v40 = vpop.f32.mrf.mxu1 }
 0x237   :  { %4573 = vmatpush1.bf16.msra.mxu0 %v6179_v35 }
 0x238   :  { %4626 = vmatpush1.bf16.msra.mxu1 %v6182_v41  ;;  %4574 = vmatprep.subr.bf16.mxu0 %v6187_v12  ;;  %v6548_v34 = vpop.f32.mrf.mxu1 }
 0x239   :  { %4627 = vmatprep.subr.bf16.mxu1 %v6190_v48  ;;  %6565 = vst [vmem:[#allocation11_spill] sm:$0xff] %v6548_v34 }
 0x23b   :  { %4575 = vmatpush1.bf16.msra.mxu0 %v6185_v57 }
 0x23c   :  { %4628 = vmatpush1.bf16.msra.mxu1 %v6188_v61  ;;  %4576 = vmatprep.subr.bf16.mxu0 %v6193_v33 }
 0x23d   :  { %4629 = vmatprep.subr.bf16.mxu1 %v6196_v46 }
 0x23f   :  { %4577 = vmatpush2.bf16.msra.mxu0 %v6191_v16 }
 0x240   :  { %4630 = vmatpush2.bf16.msra.mxu1 %v6194_v8  ;;  %4578 = vmatprep.subr.bf16.mxu0 %v6199_v58 }
 0x241   :  { %4631 = vmatprep.subr.bf16.mxu1 %v6202_v51 }
 0x243   :  { %4579 = vmatpush2.bf16.msra.mxu0 %v6197_v1 }
 0x244   :  { %4632 = vmatpush2.bf16.msra.mxu1 %v6200_v15  ;;  %4580 = vmatprep.subr.bf16.mxu0 %v6205_v17 }
 0x245   :  { %4633 = vmatprep.subr.bf16.mxu1 %v6208_v37 }
 0x247   :  { %4581 = vmatpush2.bf16.msra.mxu0 %v6203_v13 }
 0x248   :  { %4634 = vmatpush2.bf16.msra.mxu1 %v6206_v44  ;;  %4582 = vmatprep.subr.bf16.mxu0 %v6211_v20 }
 0x249   :  { %4635 = vmatprep.subr.bf16.mxu1 %v6214_v27 }
 0x24b   :  { %4583 = vmatpush2.bf16.msra.mxu0 %v6209_v47 }
 0x24c   :  { %4636 = vmatpush2.bf16.msra.mxu1 %v6212_v62  ;;  %4584 = vmatprep.subr.bf16.mxu0 %v6217_v6 }
 0x24d   :  { %4637 = vmatprep.subr.bf16.mxu1 %v6220_v60 }
 0x24f   :  { %4585 = vmatpush2.bf16.msra.mxu0 %v6215_v14 }
 0x250   :  { %4638 = vmatpush2.bf16.msra.mxu1 %v6218_v39  ;;  %4586 = vmatprep.subr.bf16.mxu0 %v6223_v19 }
 0x251   :  { %4639 = vmatprep.subr.bf16.mxu1 %v6226_v52 }
 0x253   :  { %4587 = vmatpush2.bf16.msra.mxu0 %v6221_v26 }
 0x254   :  { %4640 = vmatpush2.bf16.msra.mxu1 %v6224_v53  ;;  %4588 = vmatprep.subr.bf16.mxu0 %v6229_v3 }
 0x255   :  { %4641 = vmatprep.subr.bf16.mxu1 %v6232_v4 }
 0x257   :  { %4589 = vmatpush2.bf16.msra.mxu0 %v6227_v21 }
 0x258   :  { %4642 = vmatpush2.bf16.msra.mxu1 %v6230_v45  ;;  %4590 = vmatprep.subr.bf16.mxu0 %v6235_v22 }
 0x259   :  { %4643 = vmatprep.subr.bf16.mxu1 %v6238_v54 }
 0x25b   :  { %4591 = vmatpush2.bf16.msra.mxu0 %v6233_v49 }
 0x25c   :  { %4644 = vmatpush2.bf16.msra.mxu1 %v6236_v32 }
 0x25e   :  { %4593 = vmatmul.mubr.bf16.vlgmr.msra.gmra.mxu0 %v6269_v10  ;;  %v4276_v42 = vpop.f32.mrf.mxu0 }
 0x25f   :  { %4646 = vmatmul.mubr.bf16.vlgmr.msra.gmra.mxu1 %v6270_v36  ;;  %4602 = vmatprep.mubr.bf16.mxu0 %v6271_v23  ;;  %v4329_v9 = vpop.f32.mrf.mxu1  ;;  %v4277_v52 = vadd.f32 %v4276_v42, %v4223_v38 }
 0x260   :  { %4655 = vmatprep.mubr.bf16.mxu1 %v6272_v63  ;;  %v4278_v11 = vpop.f32.mrf.mxu0 }
 0x261   :  { %v4331_v29 = vpop.f32.mrf.mxu1  ;;  %v4279_v53 = vadd.f32 %v4278_v11, %v4225_v59  ;;  %v4330_v21 = vadd.f32 %v4329_v9, %v4277_v52 }
 0x262   :  { %v4280_v55 = vpop.f32.mrf.mxu0 }
 0x263   :  { %v4333_v24 = vpop.f32.mrf.mxu1  ;;  %v4281_v45 = vadd.f32 %v4280_v55, %v4227_v2  ;;  %v4332_v22 = vadd.f32 %v4331_v29, %v4279_v53  ;;  %v6568_v55 = vld [vmem:[#allocation11_spill] sm:$0xff] }
 0x264   :  { %v4282_v56 = vpop.f32.mrf.mxu0 }
 0x265   :  { %v4335_v28 = vpop.f32.mrf.mxu1  ;;  %v4283_v54 = vadd.f32 %v4282_v56, %v4229_v43  ;;  %v4334_v36 = vadd.f32 %v4333_v24, %v4281_v45 }
 0x266   :  { %4603 = vmatmul.mubr.bf16.gmra.mxu0 %v6273_v30  ;;  %v4286_v50 = vpop.f32.mrf.mxu0 }
 0x267   :  { %4656 = vmatmul.mubr.bf16.gmra.mxu1 %v6274_v0  ;;  %v4339_v31 = vpop.f32.mrf.mxu1  ;;  %v4287_v23 = vadd.f32 %v4286_v50, %v4233_v18  ;;  %v4336_v0 = vadd.f32 %v4335_v28, %v4283_v54 }
 0x268   :  { %v4288_v7 = vpop.f32.mrf.mxu0 }
 0x269   :  { %v4341_v35 = vpop.f32.mrf.mxu1  ;;  %v4289_v30 = vadd.f32 %v4288_v7, %v4235_v25  ;;  %v4340_v59 = vadd.f32 %v4339_v31, %v4287_v23 }
 0x26a   :  { %v4290_v5 = vpop.f32.mrf.mxu0 }
 0x26b   :  { %v4343_v12 = vpop.f32.mrf.mxu1  ;;  %v4291_v34 = vadd.f32 %v4290_v5, %v4237_v40  ;;  %v4342_v2 = vadd.f32 %v4341_v35, %v4289_v30 }
 0x26c   :  { %v4292_v41 = vpop.f32.mrf.mxu0 }
 0x26d   :  { %v4345_v57 = vpop.f32.mrf.mxu1  ;;  %v4293_v43 = vadd.f32 %v4292_v41, %v6568_v55  ;;  %v4344_v24 = vadd.f32 %v4343_v12, %v4291_v34 }
 0x26f   :  { %v4346_v40 = vadd.f32 %v4345_v57, %v4293_v43 }
 0x29e   :  { %v4382_v48 = vpop.f32.mrf.mxu0 }
 0x29f   :  { %v4435_v61 = vpop.f32.mrf.mxu1  ;;  %v4383_v49 = vadd.f32 %v4382_v48, %v4330_v21 }
 0x2a0   :  { %v4384_v33 = vpop.f32.mrf.mxu0 }
 0x2a1   :  { %v4437_v46 = vpop.f32.mrf.mxu1  ;;  %v4385_v63 = vadd.f32 %v4384_v33, %v4332_v22 }
 0x2a2   :  { %v4386_v16 = vpop.f32.mrf.mxu0 }
 0x2a3   :  { %v4439_v8 = vpop.f32.mrf.mxu1  ;;  %v4438_v11 = vadd.f32 %v4437_v46, %v4385_v63 }
 0x2a4   :  { %v4388_v58 = vpop.f32.mrf.mxu0 }
 0x2a5   :  { %v4441_v51 = vpop.f32.mrf.mxu1  ;;  %v4389_v9 = vadd.f32 %v4388_v58, %v4336_v0 }
 0x2a6   :  { %v4392_v1 = vpop.f32.mrf.mxu0 }
 0x2a7   :  { %v4445_v15 = vpop.f32.mrf.mxu1  ;;  %v4393_v56 = vadd.f32 %v4392_v1, %v4340_v59  ;;  %v4442_v28 = vadd.f32 %v4441_v51, %v4389_v9 }
 0x2a8   :  { %v4394_v17 = vpop.f32.mrf.mxu0 }
 0x2a9   :  { %v4447_v37 = vpop.f32.mrf.mxu1  ;;  %v4395_v18 = vadd.f32 %v4394_v17, %v4342_v2  ;;  %v4446_v46 = vadd.f32 %v4445_v15, %v4393_v56 }
 0x2aa   :  { %v4396_v13 = vpop.f32.mrf.mxu0 }
 0x2ab   :  { %v6550_v44 = vpop.f32.mrf.mxu1  ;;  %v4397_v5 = vadd.f32 %v4396_v13, %v4344_v24 }
 0x2ac   :  { %6566 = vst [vmem:[#allocation12_spill] sm:$0xff] %v6550_v44  ;;  %v4398_v20 = vpop.f32.mrf.mxu0  ;;  %v4387_v44 = vadd.f32 %v4386_v16, %v4334_v36 }
 0x2ad   :  { %v6552_v27 = vpop.f32.mrf.mxu1  ;;  %v4399_v41 = vadd.f32 %v4398_v20, %v4346_v40 }
 0x2ae   :  { %6567 = vst [vmem:[#allocation13_spill] sm:$0xff] %v6552_v27  ;;  %v4436_v27 = vadd.f32 %v4435_v61, %v4383_v49  ;;  %v4440_v29 = vadd.f32 %v4439_v8, %v4387_v44 }
 0x2de   :  { %v4488_v47 = vpop.f32.mrf.mxu0 }
 0x2df   :  { %v4541_v62 = vpop.f32.mrf.mxu1  ;;  %v4489_v52 = vadd.f32 %v4488_v47, %v4436_v27  ;;  %v4448_v27 = vadd.f32 %v4447_v37, %v4395_v18  ;;  %v6569_v47 = vld [vmem:[#allocation12_spill] sm:$0xff] }
 0x2e0   :  { %v4490_v6 = vpop.f32.mrf.mxu0  ;;  %v4450_v51 = vadd.f32 %v6569_v47, %v4397_v5 }
 0x2e1   :  { %v4543_v60 = vpop.f32.mrf.mxu1  ;;  %v4491_v48 = vadd.f32 %v4490_v6, %v4438_v11  ;;  %v4542_v7 = vadd.f32 %v4541_v62, %v4489_v52 }
 0x2e2   :  { %v4492_v14 = vpop.f32.mrf.mxu0 }
 0x2e3   :  { %v4545_v39 = vpop.f32.mrf.mxu1  ;;  %v4493_v61 = vadd.f32 %v4492_v14, %v4440_v29  ;;  %v4544_v16 = vadd.f32 %v4543_v60, %v4491_v48  ;;  %v6570_v60 = vld [vmem:[#allocation13_spill] sm:$0xff] }
 0x2e4   :  { %v4494_v19 = vpop.f32.mrf.mxu0 }
 0x2e5   :  { %v4547_v26 = vpop.f32.mrf.mxu1  ;;  %v4495_v58 = vadd.f32 %v4494_v19, %v4442_v28  ;;  %v4546_v44 = vadd.f32 %v4545_v39, %v4493_v61  ;;  %v4452_v19 = vadd.f32 %v6570_v60, %v4399_v41 }
 0x2e6   :  { %v4498_v3 = vpop.f32.mrf.mxu0 }
 0x2e7   :  { %v4551_v4 = vpop.f32.mrf.mxu1  ;;  %v4499_v34 = vadd.f32 %v4498_v3, %v4446_v46  ;;  %v4548_v57 = vadd.f32 %v4547_v26, %v4495_v58 }
 0x2e8   :  { %v4500_v32 = vpop.f32.mrf.mxu0 }
 0x2e9   :  { %v4553_v10 = vpop.f32.mrf.mxu1  ;;  %v4501_v13 = vadd.f32 %v4500_v32, %v4448_v27  ;;  %v4552_v20 = vadd.f32 %v4551_v4, %v4499_v34 }
 0x2ea   :  { %v4502_v38 = vpop.f32.mrf.mxu0 }
 0x2eb   :  { %v4555_v42 = vpop.f32.mrf.mxu1  ;;  %v4503_v21 = vadd.f32 %v4502_v38, %v4450_v51  ;;  %v4554_v54 = vadd.f32 %v4553_v10, %v4501_v13 }
 0x2ec   :  { %v4504_v50 = vpop.f32.mrf.mxu0 }
 0x2ed   :  { %v4557_v25 = vpop.f32.mrf.mxu1  ;;  %v4505_v49 = vadd.f32 %v4504_v50, %v4452_v19  ;;  %v4556_v63 = vadd.f32 %v4555_v42, %v4503_v21 }
 0x2ef   :  { %v4558_v4 = vadd.f32 %v4557_v25, %v4505_v49 }
 0x31e   :  { %v4594_v33 = vpop.f32.mrf.mxu0 }
 0x31f   :  { %v4647_v31 = vpop.f32.mrf.mxu1  ;;  %v4595_v35 = vadd.f32 %v4594_v33, %v4542_v7 }
 0x320   :  { %v4596_v8 = vpop.f32.mrf.mxu0 }
 0x321   :  { %v4649_v1 = vpop.f32.mrf.mxu1  ;;  %v4648_v12 = vadd.f32 %v4647_v31, %v4595_v35  ;;  %v4597_v17 = vadd.f32 %v4596_v8, %v4544_v16 }
 0x322   :  { %v4598_v62 = vpop.f32.mrf.mxu0 }
 0x323   :  { %v4651_v6 = vpop.f32.mrf.mxu1  ;;  %4668 = vst [vmem:[#allocation7 + $0x10] sm:$0xff] %v4648_v12  ;;  %v4650_v14 = vadd.f32 %v4649_v1, %v4597_v17  ;;  %v4599_v15 = vadd.f32 %v4598_v62, %v4546_v44 }
 0x324   :  { %v4600_v53 = vpop.f32.mrf.mxu0 }
 0x325   :  { %v4653_v37 = vpop.f32.mrf.mxu1  ;;  %4669 = vst [vmem:[#allocation7 + $0x18] sm:$0xff] %v4650_v14  ;;  %v4652_v39 = vadd.f32 %v4651_v6, %v4599_v15  ;;  %v4601_v3 = vadd.f32 %v4600_v53, %v4548_v57 }
 0x326   :  { %v4604_v45 = vpop.f32.mrf.mxu0 }
 0x327   :  { %v4657_v22 = vpop.f32.mrf.mxu1  ;;  %4672 = vst [vmem:[#allocation7 + $0x30] sm:$0xff] %v4652_v39  ;;  %v4654_v36 = vadd.f32 %v4653_v37, %v4601_v3  ;;  %v4605_v26 = vadd.f32 %v4604_v45, %v4552_v20 }
 0x328   :  { %v4606_v32 = vpop.f32.mrf.mxu0 }
 0x329   :  { %v4659_v23 = vpop.f32.mrf.mxu1  ;;  %4673 = vst [vmem:[#allocation7 + $0x38] sm:$0xff] %v4654_v36  ;;  %v4658_v30 = vadd.f32 %v4657_v22, %v4605_v26  ;;  %v4607_v0 = vadd.f32 %v4606_v32, %v4554_v54 }
 0x32a   :  { %v4608_v59 = vpop.f32.mrf.mxu0 }
 0x32b   :  { %v4661_v11 = vpop.f32.mrf.mxu1  ;;  %4676 = vst [vmem:[#allocation7 + $0x50] sm:$0xff] %v4658_v30  ;;  %v4660_v38 = vadd.f32 %v4659_v23, %v4607_v0  ;;  %v4609_v9 = vadd.f32 %v4608_v59, %v4556_v63 }
 0x32c   :  { %v4610_v52 = vpop.f32.mrf.mxu0 }
 0x32d   :  { %4677 = vst [vmem:[#allocation7 + $0x58] sm:$0xff] %v4660_v38  ;;  %v4662_v10 = vadd.f32 %v4661_v11, %v4609_v9  ;;  %v4611_v2 = vadd.f32 %v4610_v52, %v4558_v4  ;;  %v4663_v55 = vpop.f32.mrf.mxu1 }
 0x32f   :  { %4680 = vst [vmem:[#allocation7 + $0x70] sm:$0xff] %v4662_v10  ;;  %v4664_v43 = vadd.f32 %v4663_v55, %v4611_v2 }
 0x331   :  { %4681 = vst [vmem:[#allocation7 + $0x78] sm:$0xff] %v4664_v43 }
 0x332   :  { %6326 = shalt.err (!%p6323_p0)
}
 0x333   :  { %s6348_s24 = smov 512   ;;  %s6349_s25 = smov 32  }
 0x334   :  { %4693 = dma.vmem_to_hbm [thread:$0]  %s4688_s1, 2048, %s6562_s2, [#allocation4], %s6348_s24, %s6348_s24, %s6349_s25  }
 0x335   :  { %6339 = dma.done.wait [#allocation4], 2048  }
 0x336   :  { %6340 = vsyncadd [#allocation4], 4294965248 }
 0x337   :  { %4697 = vsyncpa [#allocation3], 1 }
 0x338   :  { %4698 = vsyncpa [#allocation6], 1 }
 0x339   :  { %4699 = vsyncpa [#allocation4], 1 }

</bundles_post_ra>
